<compile_context>
chip_gen: v7x
topology: tpu7x:2x2x1
jax: 0.10.0
libtpu: 0.0.40
codegen_flags: <defaults>
</compile_context>

<pallas_src>
import math
import numpy as np
import jax
import jax.numpy as jnp
from jax.experimental import pallas as pl
from jax.experimental.pallas import tpu as pltpu

# ----------------------------- config (small, consistent with the module) ---------------
WP = (4, 4)                                    # window_patch_shape (must be even)
P = WP[0] * WP[1]                              # patches per window = 16
NUM_HEADS = 2
EMBED_DIM = 32
HEAD_DIM = EMBED_DIM // NUM_HEADS
FF_EXPANSION = 2
FF_DIM = EMBED_DIM * FF_EXPANSION
GRID_H, GRID_W = 8, 8                          # patch grid fed to the block
WINDOW_SHAPE = (GRID_H // WP[0], GRID_W // WP[1])   # (2, 2)
NUM_WINDOWS = WINDOW_SHAPE[0] * WINDOW_SHAPE[1]
M_ROWS = GRID_H * GRID_W                       # 64 patch rows per batch element
INV_SQRT2 = 0.7071067811865476
LN_EPS = 1e-5
NEG_INF = -1e9                                 # additive mask value (exp underflows to 0.0)


# ----------------------------- mask / relative position bias ----------------------------
def generate_mask(window_shape, patch_shape, apply_shift):
    """Replicates SwinSelfAttention.generate_mask exactly (numpy)."""
    ws, ps = window_shape, patch_shape
    mask = np.zeros((ws[1], ws[0], ps[1], ps[0], ps[1], ps[0]), dtype=bool)
    if apply_shift:
        sx, sy = ps[0] // 2, ps[1] // 2
        mask[-1, :, :sy, :, sy:, :] = True
        mask[-1, :, sy:, :, :sy, :] = True
        mask[:, -1, :, :sx, :, sx:] = True
        mask[:, -1, :, sx:, :, :sx] = True
    arranged = mask.reshape(ws[1], ws[0], ps[1] * ps[0], ps[1] * ps[0])
    return jnp.asarray(arranged.reshape(-1, P, P).astype(np.float32))   # (NW, P, P)


def position_bias_indices():
    pairs = np.array([[i, j] for i in range(WP[0]) for j in range(WP[1])])
    rel = pairs[:, None, :] - pairs[None, :, :] + WP[0] - 1
    return rel[..., 0], rel[..., 1]


def gather_position_bias(position_bias):
    idx0, idx1 = position_bias_indices()
    return position_bias[:, idx0, idx1]          # (num_heads, P, P)


def dense_attn_bias(mask_f, bias_g):
    """(NUM_HEADS, 64, 64) additive bias: relative-position bias on the per-window block
    diagonal, NEG_INF for shift-masked and cross-window pairs."""
    dense = jnp.full((NUM_HEADS, M_ROWS, M_ROWS), NEG_INF, dtype=jnp.float32)
    for w in range(NUM_WINDOWS):
        blk = bias_g + jnp.where(mask_f[w] > 0.5, NEG_INF, 0.0)[None, :, :]
        dense = dense.at[:, w * P:(w + 1) * P, w * P:(w + 1) * P].set(blk)
    return dense


# ----------------------------- permutation plumbing (host / static) ---------------------
def _partition_perm():
    """Row permutation: window-layout row r <- grid row idx[r] (matches einops partition)."""
    vp, hp = WP[1], WP[0]
    vw_n, hw_n = GRID_H // vp, GRID_W // hp
    idx = np.empty(GRID_H * GRID_W, dtype=np.int32)
    for vw in range(vw_n):
        for hw in range(hw_n):
            for a in range(vp):
                for b in range(hp):
                    r = (vw * hw_n + hw) * (vp * hp) + a * hp + b
                    h = a * vw_n + vw
                    w = b * hw_n + hw
                    idx[r] = h * GRID_W + w
    return idx


def _roll_perm(shift_h, shift_w):
    """Row permutation equivalent of jnp.roll(grid, (shift_h, shift_w), axis=(0, 1))."""
    idx = np.empty(GRID_H * GRID_W, dtype=np.int32)
    for h in range(GRID_H):
        for w in range(GRID_W):
            idx[h * GRID_W + w] = (((h - shift_h) % GRID_H) * GRID_W
                                   + ((w - shift_w) % GRID_W))
    return idx


# ----------------------------- fused Pallas kernel ---------------------------------------
def swin_block_kernel(x_ref, bias_ref, wqkv_ref, bqkv_ref, wo_ref, bo_ref,
                      ln1_ref, ln2_ref, w1_ref, b1_ref, w2_ref, b2_ref, o_ref):
    f32 = jnp.float32
    x = x_ref[0]                                 # (M_ROWS, E), window layout

    def layer_norm(v, gb):                       # gb: (2, E)
        g = gb[0:1, :]
        b = gb[1:2, :]
        mu = jnp.mean(v, axis=-1, keepdims=True)
        var = jnp.mean(jnp.square(v - mu), axis=-1, keepdims=True)
        return (v - mu) * jax.lax.rsqrt(var + LN_EPS) * g + b

    ln1 = layer_norm(x, ln1_ref[...])
    # merged QKV: one (M, E) x (E, 3E) matmul; Q columns already carry 1/sqrt(head_dim)
    qkv = jnp.dot(ln1, wqkv_ref[...], preferred_element_type=f32) + bqkv_ref[...]
    wo = wo_ref[...]                             # (E, E)
    attn = None
    for h in range(NUM_HEADS):                   # static tiny loop
        lo = h * HEAD_DIM
        q = qkv[:, lo:lo + HEAD_DIM]
        k = qkv[:, EMBED_DIM + lo:EMBED_DIM + lo + HEAD_DIM]
        v = qkv[:, 2 * EMBED_DIM + lo:2 * EMBED_DIM + lo + HEAD_DIM]
        # dense (M, M) scores; contraction on last dims (no k.T materialization)
        scores = jax.lax.dot_general(q, k, (((1,), (1,)), ((), ())),
                                     preferred_element_type=f32)
        scores = scores + bias_ref[h]            # pos bias + shift mask + cross-window mask
        m = jnp.max(scores, axis=-1, keepdims=True)
        e = jnp.exp(scores - m)                  # masked entries underflow to exactly 0.0
        inv_l = pl.reciprocal(jnp.sum(e, axis=-1, keepdims=True), approx=False)
        rep = jnp.dot(e * inv_l, v, preferred_element_type=f32)           # (M, HD)
        contrib = jnp.dot(rep, wo[lo:lo + HEAD_DIM, :],
                          preferred_element_type=f32)                      # (M, E)
        attn = contrib if attn is None else attn + contrib
    y = x + attn + bo_ref[...]
    ln2 = layer_norm(y, ln2_ref[...])
    hdn = jnp.dot(ln2, w1_ref[...], preferred_element_type=f32) + b1_ref[...]
    hdn = 0.5 * hdn * (1.0 + jax.lax.erf(hdn * INV_SQRT2))   # exact GELU
    o_ref[0] = y + jnp.dot(hdn, w2_ref[...], preferred_element_type=f32) + b2_ref[...]


def _full_spec(a):
    nd = a.ndim
    return pl.BlockSpec(a.shape, lambda b, nd=nd: (0,) * nd)


def swin_block_forward_pallas(x, packed):
    """x: (B, GRID_H, GRID_W, EMBED_DIM) -> same shape (SwinTransformerBlock.forward)."""
    B = x.shape[0]
    rows = x.reshape(B, M_ROWS, EMBED_DIM)
    x_win = rows[:, packed['in_idx'], :]                      # roll + partition (layout only)

    weight_args = (packed['bias'], packed['wqkv'], packed['bqkv'], packed['wo'],
                   packed['bo'], packed['ln1'], packed['ln2'], packed['w1'],
                   packed['b1'], packed['w2'], packed['b2'])
    in_specs = ([pl.BlockSpec((1, M_ROWS, EMBED_DIM), lambda b: (b, 0, 0))]
                + [_full_spec(a) for a in weight_args])

    out = pl.pallas_call(
        swin_block_kernel,
        out_shape=jax.ShapeDtypeStruct((B, M_ROWS, EMBED_DIM), jnp.float32),
        grid=(B,),
        in_specs=in_specs,
        out_specs=pl.BlockSpec((1, M_ROWS, EMBED_DIM), lambda b: (b, 0, 0)),
        compiler_params=pltpu.CompilerParams(dimension_semantics=("parallel",)),
    )(x_win, *weight_args)

    out_grid = out[:, packed['out_idx'], :]                   # join + inverse roll
    return out_grid.reshape(B, GRID_H, GRID_W, EMBED_DIM)


# ----------------------------- parameter packing for the kernel -------------------------
def pack_block_params(bp, mask_f, bias_g, apply_shift):
    scale = 1.0 / math.sqrt(HEAD_DIM)
    wq = jnp.concatenate([bp['wqkv'][0, h] for h in range(NUM_HEADS)], axis=1) * scale
    wk = jnp.concatenate([bp['wqkv'][1, h] for h in range(NUM_HEADS)], axis=1)
    wv = jnp.concatenate([bp['wqkv'][2, h] for h in range(NUM_HEADS)], axis=1)
    bq = jnp.concatenate([bp['bqkv'][0, h] for h in range(NUM_HEADS)], axis=1) * scale
    bk = jnp.concatenate([bp['bqkv'][1, h] for h in range(NUM_HEADS)], axis=1)
    bv = jnp.concatenate([bp['bqkv'][2, h] for h in range(NUM_HEADS)], axis=1)
    wqkv = jnp.concatenate([wq, wk, wv], axis=1)              # (E, 3E)
    bqkv = jnp.concatenate([bq, bk, bv], axis=1)              # (1, 3E)

    p0 = _partition_perm()
    inv_p0 = np.empty_like(p0)
    inv_p0[p0] = np.arange(p0.size, dtype=np.int32)
    if apply_shift:
        sh, sw = -(WP[1] // 2), -(WP[0] // 2)                 # cyclic_shift
        roll_fwd = _roll_perm(sh, sw)
        roll_bwd = _roll_perm(-sh, -sw)
        in_idx = roll_fwd[p0]
        out_idx = inv_p0[roll_bwd]
    else:
        in_idx = p0
        out_idx = inv_p0

    return {
        'in_idx': jnp.asarray(in_idx),
        'out_idx': jnp.asarray(out_idx),
        'bias': dense_attn_bias(mask_f, bias_g),              # (NH, 64, 64)
        'wqkv': wqkv, 'bqkv': bqkv,
        'wo': bp['wo'], 'bo': bp['bo'],
        'ln1': bp['ln1'], 'ln2': bp['ln2'],
        'w1': bp['w1'], 'b1': bp['b1'],
        'w2': bp['w2'], 'b2': bp['b2'],
    }


# ----------------------------- pure-JAX reference (mirrors the PyTorch module) -----------
def _partition_windows_ref(x):
    B, H, W, E = x.shape
    vp, hp = WP[1], WP[0]
    vw, hw = H // vp, W // hp
    x = x.reshape(B, vp, vw, hp, hw, E).transpose(0, 2, 4, 1, 3, 5)
    return x.reshape(B, vw, hw, vp * hp, E)


def _join_windows_ref(x, H, W):
    B, vw, hw, Pp, E = x.shape
    vp, hp = WP[1], WP[0]
    x = x.reshape(B, vw, hw, vp, hp, E).transpose(0, 3, 1, 4, 2, 5)
    return x.reshape(B, H, W, E)


def _block_compute_ref(x_win, mask_f, bias_g, p):
    def ln(v, pref):
        g, b = pref[0], pref[1]
        mu = v.mean(-1, keepdims=True)
        var = ((v - mu) ** 2).mean(-1, keepdims=True)
        return (v - mu) * jax.lax.rsqrt(var + LN_EPS) * g + b

    ln1 = ln(x_win, p['ln1'])
    heads = []
    for h in range(NUM_HEADS):
        q = ln1 @ p['wqkv'][0, h] + p['bqkv'][0, h]
        k = ln1 @ p['wqkv'][1, h] + p['bqkv'][1, h]
        v = ln1 @ p['wqkv'][2, h] + p['bqkv'][2, h]
        scores = jnp.einsum('bwpd,bwqd->bwpq', q, k) / math.sqrt(HEAD_DIM)
        scores = scores + bias_g[h]
        scores = jnp.where(mask_f[None] > 0.5, -jnp.inf, scores)
        m = jnp.max(scores, axis=-1, keepdims=True)
        e = jnp.exp(scores - m)
        w = e / jnp.sum(e, axis=-1, keepdims=True)
        heads.append(jnp.einsum('bwpq,bwqd->bwpd', w, v))
    reps = jnp.concatenate(heads, -1)
    attn = reps @ p['wo'] + p['bo'][0]
    y = x_win + attn
    ln2 = ln(y, p['ln2'])
    hdn = ln2 @ p['w1'] + p['b1'][0]
    hdn = 0.5 * hdn * (1.0 + jax.lax.erf(hdn * INV_SQRT2))
    return y + hdn @ p['w2'] + p['b2'][0]


def swin_block_forward_ref(x, p, apply_shift, mask_f, bias_g):
    B, H, W, E = x.shape
    cyclic = (-(WP[1] // 2), -(WP[0] // 2)) if apply_shift else None
    if cyclic:
        x = jnp.roll(x, cyclic, axis=(1, 2))
    win = _partition_windows_ref(x)
    vw, hw = win.shape[1], win.shape[2]
    x_win = win.reshape(B, vw * hw, P, E)
    out = _block_compute_ref(x_win, mask_f, bias_g, p)
    out = _join_windows_ref(out.reshape(B, vw, hw, P, E), H, W)
    if cyclic:
        out = jnp.roll(out, (-cyclic[0], -cyclic[1]), axis=(1, 2))
    return out


# ----------------------------- parameter init --------------------------------------------
def init_block_params(key):
    def nrm(k, shape, scale=0.05):
        return scale * jax.random.normal(k, shape, dtype=jnp.float32)

    bk = jax.random.split(key, 13)
    pos_bias = nrm(bk[11], (NUM_HEADS, 2 * WP[1] - 1, 2 * WP[0] - 1), scale=0.1)
    blk = {
        'wqkv': nrm(bk[0], (3, NUM_HEADS, EMBED_DIM, HEAD_DIM)),
        'bqkv': nrm(bk[1], (3, NUM_HEADS, 1, HEAD_DIM)),
        'wo':   nrm(bk[2], (EMBED_DIM, EMBED_DIM)),
        'bo':   nrm(bk[3], (1, EMBED_DIM)),
        'ln1':  jnp.stack([1.0 + nrm(bk[4], (EMBED_DIM,)), nrm(bk[5], (EMBED_DIM,))]),
        'ln2':  jnp.stack([1.0 + nrm(bk[6], (EMBED_DIM,)), nrm(bk[7], (EMBED_DIM,))]),
        'w1':   nrm(bk[8], (EMBED_DIM, FF_DIM)),
        'b1':   nrm(bk[9], (1, FF_DIM)),
        'w2':   nrm(bk[10], (FF_DIM, EMBED_DIM)),
        'b2':   nrm(bk[12], (1, EMBED_DIM), 0.02),
    }
    return blk, gather_position_bias(pos_bias)


# ----------------------------- main -------------------------------------------------------
if __name__ == "__main__":
    key = jax.random.PRNGKey(0)
    k_x, k_p0, k_p1 = jax.random.split(key, 3)
    x = jax.random.normal(k_x, (2, GRID_H, GRID_W, EMBED_DIM), dtype=jnp.float32)

    # exercise both module configurations: apply_shift=False and apply_shift=True
    for apply_shift, kp in ((False, k_p0), (True, k_p1)):
        bp, bias_g = init_block_params(kp)
        mask_f = generate_mask(WINDOW_SHAPE, WP, apply_shift)
        packed = pack_block_params(bp, mask_f, bias_g, apply_shift)

        out = jax.block_until_ready(swin_block_forward_pallas(x, packed))
        ref = jax.block_until_ready(swin_block_forward_ref(x, bp, apply_shift, mask_f, bias_g))

        assert out.shape == (2, GRID_H, GRID_W, EMBED_DIM), out.shape
        max_err = float(jnp.max(jnp.abs(out - ref)))
        assert jnp.allclose(out, ref, atol=1e-4, rtol=1e-4), (apply_shift, max_err)

    print("KERNEL_OK")
</pallas_src>

<mosaic_0001>
module attributes {stable_mosaic.version = 11 : i64} {
  func.func @swin_block_kernel(%arg0: i32, %arg1: memref<1x64x32xf32, #tpu.memory_space<vmem>>, %arg2: memref<2x64x64xf32, #tpu.memory_space<vmem>>, %arg3: memref<32x96xf32, #tpu.memory_space<vmem>>, %arg4: memref<1x96xf32, #tpu.memory_space<vmem>>, %arg5: memref<32x32xf32, #tpu.memory_space<vmem>>, %arg6: memref<1x32xf32, #tpu.memory_space<vmem>>, %arg7: memref<2x32xf32, #tpu.memory_space<vmem>>, %arg8: memref<2x32xf32, #tpu.memory_space<vmem>>, %arg9: memref<32x64xf32, #tpu.memory_space<vmem>>, %arg10: memref<1x64xf32, #tpu.memory_space<vmem>>, %arg11: memref<64x32xf32, #tpu.memory_space<vmem>>, %arg12: memref<1x32xf32, #tpu.memory_space<vmem>>, %arg13: memref<1x64x32xf32, #tpu.memory_space<vmem>>) attributes {dimension_semantics = [#tpu.dimension_semantics<parallel>], iteration_bounds = array<i64: 2>, scalar_prefetch = 0 : i64, scratch_operands = 0 : i64, tpu.core_type = #tpu.core_type<tc>, window_params = [{transform_indices = @transform_0, window_bounds = array<i64: 1, 64, 32>}, {pipeline_mode = #tpu.pipeline_mode<synchronous>, transform_indices = @transform_1, window_bounds = array<i64: 2, 64, 64>}, {pipeline_mode = #tpu.pipeline_mode<synchronous>, transform_indices = @transform_2, window_bounds = array<i64: 32, 96>}, {pipeline_mode = #tpu.pipeline_mode<synchronous>, transform_indices = @transform_3, window_bounds = array<i64: 1, 96>}, {pipeline_mode = #tpu.pipeline_mode<synchronous>, transform_indices = @transform_4, window_bounds = array<i64: 32, 32>}, {pipeline_mode = #tpu.pipeline_mode<synchronous>, transform_indices = @transform_5, window_bounds = array<i64: 1, 32>}, {pipeline_mode = #tpu.pipeline_mode<synchronous>, transform_indices = @transform_6, window_bounds = array<i64: 2, 32>}, {pipeline_mode = #tpu.pipeline_mode<synchronous>, transform_indices = @transform_7, window_bounds = array<i64: 2, 32>}, {pipeline_mode = #tpu.pipeline_mode<synchronous>, transform_indices = @transform_8, window_bounds = array<i64: 32, 64>}, {pipeline_mode = #tpu.pipeline_mode<synchronous>, transform_indices = @transform_9, window_bounds = array<i64: 1, 64>}, {pipeline_mode = #tpu.pipeline_mode<synchronous>, transform_indices = @transform_10, window_bounds = array<i64: 64, 32>}, {pipeline_mode = #tpu.pipeline_mode<synchronous>, transform_indices = @transform_11, window_bounds = array<i64: 1, 32>}, {transform_indices = @transform_12, window_bounds = array<i64: 1, 64, 32>}]} {
    %c0 = arith.constant 0 : index
    %c0_0 = arith.constant 0 : index
    %c0_1 = arith.constant 0 : index
    %0 = vector.load %arg1[%c0, %c0_0, %c0_1] : memref<1x64x32xf32, #tpu.memory_space<vmem>>, vector<1x64x32xf32>
    %1 = vector.shape_cast %0 : vector<1x64x32xf32> to vector<64x32xf32>
    %c0_2 = arith.constant 0 : index
    %c0_3 = arith.constant 0 : index
    %2 = vector.load %arg7[%c0_2, %c0_3] : memref<2x32xf32, #tpu.memory_space<vmem>>, vector<2x32xf32>
    %3 = vector.extract_strided_slice %2 {offsets = [0, 0], sizes = [1, 32], strides = [1, 1]} : vector<2x32xf32> to vector<1x32xf32>
    %4 = vector.extract_strided_slice %2 {offsets = [1, 0], sizes = [1, 32], strides = [1, 1]} : vector<2x32xf32> to vector<1x32xf32>
    %cst = arith.constant dense<0.000000e+00> : vector<64xf32>
    %5 = vector.multi_reduction <add>, %1, %cst [1] : vector<64x32xf32> to vector<64xf32>
    %6 = vector.shape_cast %5 : vector<64xf32> to vector<64x1xf32>
    %cst_4 = arith.constant 3.200000e+01 : f32
    %7 = vector.broadcast %cst_4 : f32 to vector<64x1xf32>
    %8 = arith.divf %6, %7 : vector<64x1xf32>
    %9 = vector.broadcast %8 : vector<64x1xf32> to vector<64x32xf32>
    %10 = arith.subf %1, %9 : vector<64x32xf32>
    %11 = arith.mulf %10, %10 : vector<64x32xf32>
    %cst_5 = arith.constant dense<0.000000e+00> : vector<64xf32>
    %12 = vector.multi_reduction <add>, %11, %cst_5 [1] : vector<64x32xf32> to vector<64xf32>
    %13 = vector.shape_cast %12 : vector<64xf32> to vector<64x1xf32>
    %cst_6 = arith.constant 3.200000e+01 : f32
    %14 = vector.broadcast %cst_6 : f32 to vector<64x1xf32>
    %15 = arith.divf %13, %14 : vector<64x1xf32>
    %16 = vector.broadcast %8 : vector<64x1xf32> to vector<64x32xf32>
    %17 = arith.subf %1, %16 : vector<64x32xf32>
    %cst_7 = arith.constant 9.99999974E-6 : f32
    %18 = vector.broadcast %cst_7 : f32 to vector<64x1xf32>
    %19 = arith.addf %15, %18 : vector<64x1xf32>
    %20 = math.rsqrt %19 : vector<64x1xf32>
    %21 = vector.broadcast %20 : vector<64x1xf32> to vector<64x32xf32>
    %22 = arith.mulf %17, %21 : vector<64x32xf32>
    %23 = vector.broadcast %3 : vector<1x32xf32> to vector<64x32xf32>
    %24 = arith.mulf %22, %23 : vector<64x32xf32>
    %25 = vector.broadcast %4 : vector<1x32xf32> to vector<64x32xf32>
    %26 = arith.addf %24, %25 : vector<64x32xf32>
    %c0_8 = arith.constant 0 : index
    %c0_9 = arith.constant 0 : index
    %27 = vector.load %arg3[%c0_8, %c0_9] : memref<32x96xf32, #tpu.memory_space<vmem>>, vector<32x96xf32>
    %cst_10 = arith.constant dense<0.000000e+00> : vector<64x96xf32>
    %28 = tpu.matmul %26, %27, %cst_10 {dimension_numbers = #tpu.dot_dimension_numbers<[1], [0], [0], [1], [0, 0, 1, 1], [], []>} : vector<64x32xf32>, vector<32x96xf32>, vector<64x96xf32> -> vector<64x96xf32>
    %c0_11 = arith.constant 0 : index
    %c0_12 = arith.constant 0 : index
    %29 = vector.load %arg4[%c0_11, %c0_12] : memref<1x96xf32, #tpu.memory_space<vmem>>, vector<1x96xf32>
    %30 = vector.broadcast %29 : vector<1x96xf32> to vector<64x96xf32>
    %31 = arith.addf %28, %30 : vector<64x96xf32>
    %c0_13 = arith.constant 0 : index
    %c0_14 = arith.constant 0 : index
    %32 = vector.load %arg5[%c0_13, %c0_14] : memref<32x32xf32, #tpu.memory_space<vmem>>, vector<32x32xf32>
    %33 = vector.extract_strided_slice %31 {offsets = [0, 0], sizes = [64, 16], strides = [1, 1]} : vector<64x96xf32> to vector<64x16xf32>
    %34 = vector.extract_strided_slice %31 {offsets = [0, 32], sizes = [64, 16], strides = [1, 1]} : vector<64x96xf32> to vector<64x16xf32>
    %35 = vector.extract_strided_slice %31 {offsets = [0, 64], sizes = [64, 16], strides = [1, 1]} : vector<64x96xf32> to vector<64x16xf32>
    %cst_15 = arith.constant dense<0.000000e+00> : vector<64x64xf32>
    %36 = tpu.matmul %33, %34, %cst_15 {dimension_numbers = #tpu.dot_dimension_numbers<[1], [1], [0], [0], [0, 0, 1, 0], [], []>} : vector<64x16xf32>, vector<64x16xf32>, vector<64x64xf32> -> vector<64x64xf32>
    %c0_16 = arith.constant 0 : index
    %c0_17 = arith.constant 0 : index
    %c0_18 = arith.constant 0 : index
    %37 = vector.load %arg2[%c0_16, %c0_17, %c0_18] : memref<2x64x64xf32, #tpu.memory_space<vmem>>, vector<1x64x64xf32>
    %38 = vector.shape_cast %37 : vector<1x64x64xf32> to vector<64x64xf32>
    %39 = arith.addf %36, %38 : vector<64x64xf32>
    %cst_19 = arith.constant dense<0xFF800000> : vector<64xf32>
    %40 = vector.multi_reduction <maximumf>, %39, %cst_19 [1] : vector<64x64xf32> to vector<64xf32>
    %41 = vector.shape_cast %40 : vector<64xf32> to vector<64x1xf32>
    %42 = vector.broadcast %41 : vector<64x1xf32> to vector<64x64xf32>
    %43 = arith.subf %39, %42 : vector<64x64xf32>
    %44 = math.exp %43 : vector<64x64xf32>
    %cst_20 = arith.constant dense<0.000000e+00> : vector<64xf32>
    %45 = vector.multi_reduction <add>, %44, %cst_20 [1] : vector<64x64xf32> to vector<64xf32>
    %46 = vector.shape_cast %45 : vector<64xf32> to vector<64x1xf32>
    %47 = tpu.reciprocal %46 : vector<64x1xf32> -> vector<64x1xf32>
    %48 = vector.broadcast %47 : vector<64x1xf32> to vector<64x64xf32>
    %49 = arith.mulf %44, %48 : vector<64x64xf32>
    %cst_21 = arith.constant dense<0.000000e+00> : vector<64x16xf32>
    %50 = tpu.matmul %49, %35, %cst_21 {dimension_numbers = #tpu.dot_dimension_numbers<[1], [0], [0], [1], [0, 0, 1, 1], [], []>} : vector<64x64xf32>, vector<64x16xf32>, vector<64x16xf32> -> vector<64x16xf32>
    %51 = vector.extract_strided_slice %32 {offsets = [0, 0], sizes = [16, 32], strides = [1, 1]} : vector<32x32xf32> to vector<16x32xf32>
    %cst_22 = arith.constant dense<0.000000e+00> : vector<64x32xf32>
    %52 = tpu.matmul %50, %51, %cst_22 {dimension_numbers = #tpu.dot_dimension_numbers<[1], [0], [0], [1], [0, 0, 1, 1], [], []>} : vector<64x16xf32>, vector<16x32xf32>, vector<64x32xf32> -> vector<64x32xf32>
    %53 = vector.extract_strided_slice %31 {offsets = [0, 16], sizes = [64, 16], strides = [1, 1]} : vector<64x96xf32> to vector<64x16xf32>
    %54 = vector.extract_strided_slice %31 {offsets = [0, 48], sizes = [64, 16], strides = [1, 1]} : vector<64x96xf32> to vector<64x16xf32>
    %55 = vector.extract_strided_slice %31 {offsets = [0, 80], sizes = [64, 16], strides = [1, 1]} : vector<64x96xf32> to vector<64x16xf32>
    %cst_23 = arith.constant dense<0.000000e+00> : vector<64x64xf32>
    %56 = tpu.matmul %53, %54, %cst_23 {dimension_numbers = #tpu.dot_dimension_numbers<[1], [1], [0], [0], [0, 0, 1, 0], [], []>} : vector<64x16xf32>, vector<64x16xf32>, vector<64x64xf32> -> vector<64x64xf32>
    %c1 = arith.constant 1 : index
    %c0_24 = arith.constant 0 : index
    %c0_25 = arith.constant 0 : index
    %57 = vector.load %arg2[%c1, %c0_24, %c0_25] : memref<2x64x64xf32, #tpu.memory_space<vmem>>, vector<1x64x64xf32>
    %58 = vector.shape_cast %57 : vector<1x64x64xf32> to vector<64x64xf32>
    %59 = arith.addf %56, %58 : vector<64x64xf32>
    %cst_26 = arith.constant dense<0xFF800000> : vector<64xf32>
    %60 = vector.multi_reduction <maximumf>, %59, %cst_26 [1] : vector<64x64xf32> to vector<64xf32>
    %61 = vector.shape_cast %60 : vector<64xf32> to vector<64x1xf32>
    %62 = vector.broadcast %61 : vector<64x1xf32> to vector<64x64xf32>
    %63 = arith.subf %59, %62 : vector<64x64xf32>
    %64 = math.exp %63 : vector<64x64xf32>
    %cst_27 = arith.constant dense<0.000000e+00> : vector<64xf32>
    %65 = vector.multi_reduction <add>, %64, %cst_27 [1] : vector<64x64xf32> to vector<64xf32>
    %66 = vector.shape_cast %65 : vector<64xf32> to vector<64x1xf32>
    %67 = tpu.reciprocal %66 : vector<64x1xf32> -> vector<64x1xf32>
    %68 = vector.broadcast %67 : vector<64x1xf32> to vector<64x64xf32>
    %69 = arith.mulf %64, %68 : vector<64x64xf32>
    %cst_28 = arith.constant dense<0.000000e+00> : vector<64x16xf32>
    %70 = tpu.matmul %69, %55, %cst_28 {dimension_numbers = #tpu.dot_dimension_numbers<[1], [0], [0], [1], [0, 0, 1, 1], [], []>} : vector<64x64xf32>, vector<64x16xf32>, vector<64x16xf32> -> vector<64x16xf32>
    %71 = vector.extract_strided_slice %32 {offsets = [16, 0], sizes = [16, 32], strides = [1, 1]} : vector<32x32xf32> to vector<16x32xf32>
    %cst_29 = arith.constant dense<0.000000e+00> : vector<64x32xf32>
    %72 = tpu.matmul %70, %71, %cst_29 {dimension_numbers = #tpu.dot_dimension_numbers<[1], [0], [0], [1], [0, 0, 1, 1], [], []>} : vector<64x16xf32>, vector<16x32xf32>, vector<64x32xf32> -> vector<64x32xf32>
    %73 = arith.addf %52, %72 : vector<64x32xf32>
    %74 = arith.addf %1, %73 : vector<64x32xf32>
    %c0_30 = arith.constant 0 : index
    %c0_31 = arith.constant 0 : index
    %75 = vector.load %arg6[%c0_30, %c0_31] : memref<1x32xf32, #tpu.memory_space<vmem>>, vector<1x32xf32>
    %76 = vector.broadcast %75 : vector<1x32xf32> to vector<64x32xf32>
    %77 = arith.addf %74, %76 : vector<64x32xf32>
    %c0_32 = arith.constant 0 : index
    %c0_33 = arith.constant 0 : index
    %78 = vector.load %arg8[%c0_32, %c0_33] : memref<2x32xf32, #tpu.memory_space<vmem>>, vector<2x32xf32>
    %79 = vector.extract_strided_slice %78 {offsets = [0, 0], sizes = [1, 32], strides = [1, 1]} : vector<2x32xf32> to vector<1x32xf32>
    %80 = vector.extract_strided_slice %78 {offsets = [1, 0], sizes = [1, 32], strides = [1, 1]} : vector<2x32xf32> to vector<1x32xf32>
    %cst_34 = arith.constant dense<0.000000e+00> : vector<64xf32>
    %81 = vector.multi_reduction <add>, %77, %cst_34 [1] : vector<64x32xf32> to vector<64xf32>
    %82 = vector.shape_cast %81 : vector<64xf32> to vector<64x1xf32>
    %cst_35 = arith.constant 3.200000e+01 : f32
    %83 = vector.broadcast %cst_35 : f32 to vector<64x1xf32>
    %84 = arith.divf %82, %83 : vector<64x1xf32>
    %85 = vector.broadcast %84 : vector<64x1xf32> to vector<64x32xf32>
    %86 = arith.subf %77, %85 : vector<64x32xf32>
    %87 = arith.mulf %86, %86 : vector<64x32xf32>
    %cst_36 = arith.constant dense<0.000000e+00> : vector<64xf32>
    %88 = vector.multi_reduction <add>, %87, %cst_36 [1] : vector<64x32xf32> to vector<64xf32>
    %89 = vector.shape_cast %88 : vector<64xf32> to vector<64x1xf32>
    %cst_37 = arith.constant 3.200000e+01 : f32
    %90 = vector.broadcast %cst_37 : f32 to vector<64x1xf32>
    %91 = arith.divf %89, %90 : vector<64x1xf32>
    %92 = vector.broadcast %84 : vector<64x1xf32> to vector<64x32xf32>
    %93 = arith.subf %77, %92 : vector<64x32xf32>
    %cst_38 = arith.constant 9.99999974E-6 : f32
    %94 = vector.broadcast %cst_38 : f32 to vector<64x1xf32>
    %95 = arith.addf %91, %94 : vector<64x1xf32>
    %96 = math.rsqrt %95 : vector<64x1xf32>
    %97 = vector.broadcast %96 : vector<64x1xf32> to vector<64x32xf32>
    %98 = arith.mulf %93, %97 : vector<64x32xf32>
    %99 = vector.broadcast %79 : vector<1x32xf32> to vector<64x32xf32>
    %100 = arith.mulf %98, %99 : vector<64x32xf32>
    %101 = vector.broadcast %80 : vector<1x32xf32> to vector<64x32xf32>
    %102 = arith.addf %100, %101 : vector<64x32xf32>
    %c0_39 = arith.constant 0 : index
    %c0_40 = arith.constant 0 : index
    %103 = vector.load %arg9[%c0_39, %c0_40] : memref<32x64xf32, #tpu.memory_space<vmem>>, vector<32x64xf32>
    %cst_41 = arith.constant dense<0.000000e+00> : vector<64x64xf32>
    %104 = tpu.matmul %102, %103, %cst_41 {dimension_numbers = #tpu.dot_dimension_numbers<[1], [0], [0], [1], [0, 0, 1, 1], [], []>} : vector<64x32xf32>, vector<32x64xf32>, vector<64x64xf32> -> vector<64x64xf32>
    %c0_42 = arith.constant 0 : index
    %c0_43 = arith.constant 0 : index
    %105 = vector.load %arg10[%c0_42, %c0_43] : memref<1x64xf32, #tpu.memory_space<vmem>>, vector<1x64xf32>
    %106 = vector.broadcast %105 : vector<1x64xf32> to vector<64x64xf32>
    %107 = arith.addf %104, %106 : vector<64x64xf32>
    %cst_44 = arith.constant 5.000000e-01 : f32
    %108 = vector.broadcast %cst_44 : f32 to vector<64x64xf32>
    %109 = arith.mulf %108, %107 : vector<64x64xf32>
    %cst_45 = arith.constant 0.707106769 : f32
    %110 = vector.broadcast %cst_45 : f32 to vector<64x64xf32>
    %111 = arith.mulf %107, %110 : vector<64x64xf32>
    %112 = math.erf %111 : vector<64x64xf32>
    %cst_46 = arith.constant 1.000000e+00 : f32
    %113 = vector.broadcast %cst_46 : f32 to vector<64x64xf32>
    %114 = arith.addf %113, %112 : vector<64x64xf32>
    %115 = arith.mulf %109, %114 : vector<64x64xf32>
    %c0_47 = arith.constant 0 : index
    %c0_48 = arith.constant 0 : index
    %116 = vector.load %arg11[%c0_47, %c0_48] : memref<64x32xf32, #tpu.memory_space<vmem>>, vector<64x32xf32>
    %cst_49 = arith.constant dense<0.000000e+00> : vector<64x32xf32>
    %117 = tpu.matmul %115, %116, %cst_49 {dimension_numbers = #tpu.dot_dimension_numbers<[1], [0], [0], [1], [0, 0, 1, 1], [], []>} : vector<64x64xf32>, vector<64x32xf32>, vector<64x32xf32> -> vector<64x32xf32>
    %118 = arith.addf %77, %117 : vector<64x32xf32>
    %c0_50 = arith.constant 0 : index
    %c0_51 = arith.constant 0 : index
    %119 = vector.load %arg12[%c0_50, %c0_51] : memref<1x32xf32, #tpu.memory_space<vmem>>, vector<1x32xf32>
    %120 = vector.broadcast %119 : vector<1x32xf32> to vector<64x32xf32>
    %121 = arith.addf %118, %120 : vector<64x32xf32>
    %c0_52 = arith.constant 0 : index
    %c0_53 = arith.constant 0 : index
    %c0_54 = arith.constant 0 : index
    %122 = vector.load %arg13[%c0_52, %c0_53, %c0_54] : memref<1x64x32xf32, #tpu.memory_space<vmem>>, vector<1x64x32xf32>
    %123 = vector.shape_cast %122 : vector<1x64x32xf32> to vector<64x32xf32>
    %124 = vector.shape_cast %121 : vector<64x32xf32> to vector<1x64x32xf32>
    tpu.vector_store %arg13[%c0_52, %c0_53, %c0_54], %124 {strides = array<i32>} : memref<1x64x32xf32, #tpu.memory_space<vmem>>, vector<1x64x32xf32>,
    return
  }
  func.func @transform_0(%arg0: i32) -> (i32, i32, i32) {
    %c0_i32 = arith.constant 0 : i32
    %c0_i32_0 = arith.constant 0 : i32
    %c0_i32_1 = arith.constant 0 : i32
    return %arg0, %c0_i32, %c0_i32_0 : i32, i32, i32
  }
  func.func @transform_1(%arg0: i32) -> (i32, i32, i32) {
    %c0_i32 = arith.constant 0 : i32
    %c0_i32_0 = arith.constant 0 : i32
    %c0_i32_1 = arith.constant 0 : i32
    %c0_i32_2 = arith.constant 0 : i32
    return %c0_i32, %c0_i32_0, %c0_i32_1 : i32, i32, i32
  }
  func.func @transform_2(%arg0: i32) -> (i32, i32) {
    %c0_i32 = arith.constant 0 : i32
    %c0_i32_0 = arith.constant 0 : i32
    %c0_i32_1 = arith.constant 0 : i32
    return %c0_i32, %c0_i32_0 : i32, i32
  }
  func.func @transform_3(%arg0: i32) -> (i32, i32) {
    %c0_i32 = arith.constant 0 : i32
    %c0_i32_0 = arith.constant 0 : i32
    %c0_i32_1 = arith.constant 0 : i32
    return %c0_i32, %c0_i32_0 : i32, i32
  }
  func.func @transform_4(%arg0: i32) -> (i32, i32) {
    %c0_i32 = arith.constant 0 : i32
    %c0_i32_0 = arith.constant 0 : i32
    %c0_i32_1 = arith.constant 0 : i32
    return %c0_i32, %c0_i32_0 : i32, i32
  }
  func.func @transform_5(%arg0: i32) -> (i32, i32) {
    %c0_i32 = arith.constant 0 : i32
    %c0_i32_0 = arith.constant 0 : i32
    %c0_i32_1 = arith.constant 0 : i32
    return %c0_i32, %c0_i32_0 : i32, i32
  }
  func.func @transform_6(%arg0: i32) -> (i32, i32) {
    %c0_i32 = arith.constant 0 : i32
    %c0_i32_0 = arith.constant 0 : i32
    %c0_i32_1 = arith.constant 0 : i32
    return %c0_i32, %c0_i32_0 : i32, i32
  }
  func.func @transform_7(%arg0: i32) -> (i32, i32) {
    %c0_i32 = arith.constant 0 : i32
    %c0_i32_0 = arith.constant 0 : i32
    %c0_i32_1 = arith.constant 0 : i32
    return %c0_i32, %c0_i32_0 : i32, i32
  }
  func.func @transform_8(%arg0: i32) -> (i32, i32) {
    %c0_i32 = arith.constant 0 : i32
    %c0_i32_0 = arith.constant 0 : i32
    %c0_i32_1 = arith.constant 0 : i32
    return %c0_i32, %c0_i32_0 : i32, i32
  }
  func.func @transform_9(%arg0: i32) -> (i32, i32) {
    %c0_i32 = arith.constant 0 : i32
    %c0_i32_0 = arith.constant 0 : i32
    %c0_i32_1 = arith.constant 0 : i32
    return %c0_i32, %c0_i32_0 : i32, i32
  }
  func.func @transform_10(%arg0: i32) -> (i32, i32) {
    %c0_i32 = arith.constant 0 : i32
    %c0_i32_0 = arith.constant 0 : i32
    %c0_i32_1 = arith.constant 0 : i32
    return %c0_i32, %c0_i32_0 : i32, i32
  }
  func.func @transform_11(%arg0: i32) -> (i32, i32) {
    %c0_i32 = arith.constant 0 : i32
    %c0_i32_0 = arith.constant 0 : i32
    %c0_i32_1 = arith.constant 0 : i32
    return %c0_i32, %c0_i32_0 : i32, i32
  }
  func.func @transform_12(%arg0: i32) -> (i32, i32, i32) {
    %c0_i32 = arith.constant 0 : i32
    %c0_i32_0 = arith.constant 0 : i32
    %c0_i32_1 = arith.constant 0 : i32
    return %arg0, %c0_i32, %c0_i32_0 : i32, i32, i32
  }
}

</mosaic_0001>

<bundles_post_ra>
// kernel: tpu_custom_call.1
= control target key start
LH: loop header
LB: loop body
LE: loop exit
PB: predicated region body
PF: predicated region fallthrough
CT: control target
= control target key end

     0   :  { %s3217_s21 = smov 0   ;;  %s3851_s0 = inlined_call_operand.vmem [shape: f32[2,64,32], index: 0, kind: input, shape index: {}]   ;;  %s3852_s1 = inlined_call_operand.vmem [shape: f32[2,64,64], index: 1, kind: input, shape index: {}]   ;;  %s3853_s2 = inlined_call_operand.vmem [shape: f32[32,96], index: 2, kind: input, shape index: {}]   ;;  %s3854_s3 = inlined_call_operand.vmem [shape: f32[1,96], index: 3, kind: input, shape index: {}]   ;;  %s3855_s4 = inlined_call_operand.vmem [shape: f32[32,32], index: 4, kind: input, shape index: {}]   ;;  %s3856_s5 = inlined_call_operand.vmem [shape: f32[1,32], index: 5, kind: input, shape index: {}]   ;;  %s3857_s6 = inlined_call_operand.vmem [shape: f32[2,32], index: 6, kind: input, shape index: {}]   ;;  %s3858_s7 = inlined_call_operand.vmem [shape: f32[2,32], index: 7, kind: input, shape index: {}]   ;;  %s3859_s8 = inlined_call_operand.vmem [shape: f32[32,64], index: 8, kind: input, shape index: {}]   ;;  %s3860_s9 = inlined_call_operand.vmem [shape: f32[1,64], index: 9, kind: input, shape index: {}]   ;;  %s3861_s10 = inlined_call_operand.vmem [shape: f32[64,32], index: 10, kind: input, shape index: {}]   ;;  %s3862_s11 = inlined_call_operand.vmem [shape: f32[1,32], index: 11, kind: input, shape index: {}]   ;;  %s3863_s12 = inlined_call_operand.vmem [shape: f32[2,64,32], index: 12, kind: output, shape index: {}]  }
   0x1 LB: > { %s2341_s22 = sadd.s32 4294967295, %s3145_s21   ;;  %p2345_p0 = scmp.ge.s32.totalorder %s3145_s21, 1  ;;  %s3145_s21 = sphi %s3217_s21, %s22_s21  }
   0x2   : > { %p362_p1 = scmp.lt.s32.totalorder %s3145_s21, 3 }
   0x4   : > { %p363_p2 = pnand %p2345_p0, %p362_p1 }
   0x5   : > { %p404_p3 = scmp.lt.s32.totalorder (!%p363_p2), %s2341_s22, 1  ;;  %vm423_vm0 = vcmask (!%p363_p2), 261120   ;;  %v553_v56 = vld [vmem:[%s3853_s2] sm:$0xff] (!%p363_p2)  ;;  %v554_v57 = vld [vmem:[%s3853_s2 + $0x8] sm:$0xff] (!%p363_p2)  ;;  %v555_v59 = vld [vmem:[%s3853_s2 + $0x10] sm:$0xff] (!%p363_p2)  ;;  %vm729_vm1 = vcmask (!%p363_p2), 130048  }
   0x6   : > { %366 = sbr.rel (%p363_p2) target bundleno = 3074 (0xc02), region = 68  ;;  %v2790_v58 = vpack.c.bf16 (!%p363_p2), %v554_v57, %v553_v56  ;;  %v556_v60 = vld [vmem:[%s3853_s2 + $0x18] sm:$0xff] (!%p363_p2)  ;;  %s3147_s24 = smov (!%p363_p2), 96   ;;  %vm3373_vm2 = vmpackc.low (!%p363_p2), %vm729_vm1, %vm729_vm1  ;;  %vm867_vm3 = vcmask (!%p363_p2), 523264  }
   0x7   : > { %v2794_v61 = vpack.c.bf16 (!%p363_p2), %v556_v60, %v555_v59  ;;  %s3148_s28 = smov (!%p363_p2), 64   ;;  %s3149_s29 = smov (!%p363_p2), 80  }
   0x8   : > { %2791 = vmatprep.subr.bf16.mxu0 (!%p363_p2), %v2790_v58  ;;  %s3150_s30 = smov (!%p363_p2), 112   ;;  %s3151_s15 = smov (!%p363_p2), 48  }
   0x9   : > { %2793 = vmatpush3.bf16.msra.mxu0 (!%p363_p2), %v2790_v58 }
   0xa   : > { %2795 = vmatprep.subr.bf16.mxu0 (!%p363_p2), %v2794_v61 }
   0xd   : > { %s3867_s22 = smov (!%p404_p3, %s2341_s22), 1  ;;  %2797 = vmatpush3.bf16.msra.mxu0 %v2794_v61 }
   0xe   : > { %s2452_s23 = sshll.u32 %s3867_s22, 6 }
   0xf   : > { %s3233_s26 = scalar_lea.vmem %s3851_s0, %s2452_s23  ;;  %s413_s13 = scalar_lea.vmem %s3863_s12, %s2452_s23 }
  0x10   : > { %v414_v0 = vld [vmem:[%s3233_s26] sm:$0xff]  ;;  %v416_v1 = vld [vmem:[%s3233_s26 + $0x10] sm:$0xff]  ;;  %v415_v2 = vld [vmem:[%s3233_s26 + $0x8] sm:$0xff] }
  0x11   : > { %v424_v3 = vsel %vm423_vm0, %v414_v0, 0.0  ;;  %v430_v4 = vsel %vm423_vm0, %v416_v1, 0.0  ;;  %v417_v5 = vld [vmem:[%s3233_s26 + $0x18] sm:$0xff]  ;;  %v427_v6 = vsel %vm423_vm0, %v415_v2, 0.0  ;;  %v418_v8 = vld [vmem:[%s3233_s26 + $0x20] sm:$0xff]  ;;  %v419_v9 = vld [vmem:[%s3233_s26 + $0x28] sm:$0xff] }
  0x12   : > { %425 = vadd.xlane.f32.xlu0 %v424_v3  ;;  %431 = vadd.xlane.f32.xlu1 %v430_v4  ;;  %v433_v7 = vsel %vm423_vm0, %v417_v5, 0.0  ;;  %v436_v10 = vsel %vm423_vm0, %v418_v8, 0.0  ;;  %v439_v11 = vsel %vm423_vm0, %v419_v9, 0.0  ;;  %v420_v12 = vld [vmem:[%s3233_s26 + $0x30] sm:$0xff]  ;;  %v421_v13 = vld [vmem:[%s3233_s26 + $0x38] sm:$0xff] }
  0x13   : > { %v442_v14 = vsel %vm423_vm0, %v420_v12, 0.0  ;;  %v445_v15 = vsel %vm423_vm0, %v421_v13, 0.0 }
  0x16   : > { %428 = vadd.xlane.f32.xlu0 %v427_v6  ;;  %434 = vadd.xlane.f32.xlu1 %v433_v7 }
  0x1a   : > { %437 = vadd.xlane.f32.xlu0 %v436_v10  ;;  %440 = vadd.xlane.f32.xlu1 %v439_v11 }
  0x1e   : > { %443 = vadd.xlane.f32.xlu0 %v442_v14  ;;  %446 = vadd.xlane.f32.xlu1 %v445_v15 }
  0x9f   : > { %v426_v16 = vpop.xlane.xlu0 %425  ;;  %v432_v17 = vpop.xlane.xlu1 %431 }
  0xa0   : > { %v449_v18 = vmul.f32 0.03125, %v426_v16  ;;  %v451_v19 = vmul.f32 0.03125, %v432_v17  ;;  %v422_v16 = vld [vmem:[%s3857_s6] sm:$0x3] }
  0xa2   : > { %v3251_v20 = vsub.f32 %v414_v0, %v449_v18  ;;  %v3253_v21 = vsub.f32 %v416_v1, %v451_v19  ;;  %v529_v0 = vlaneseq }
  0xa3   : > { %v429_v22 = vpop.xlane.xlu0 %428  ;;  %v435_v23 = vpop.xlane.xlu1 %434 }
  0xa4   : > { %v450_v24 = vmul.f32 0.03125, %v429_v22  ;;  %v452_v25 = vmul.f32 0.03125, %v435_v23  ;;  %v465_v26 = vmul.f32 %v3251_v20, %v3251_v20  ;;  %v467_v27 = vmul.f32 %v3253_v21, %v3253_v21 }
  0xa5   : > { %v3303_v6 = vshrl.u32 %v529_v0, 7 }
  0xa6   : > { %v3259_v28 = vsub.f32 %v415_v2, %v450_v24  ;;  %v3261_v29 = vsub.f32 %v417_v5, %v452_v25  ;;  %v473_v30 = vsel %vm423_vm0, %v465_v26, 0.0  ;;  %v479_v33 = vsel %vm423_vm0, %v467_v27, 0.0 }
  0xa7   : > { %474 = vadd.xlane.f32.xlu0 %v473_v30  ;;  %v438_v31 = vpop.xlane.xlu0 %437  ;;  %v441_v32 = vpop.xlane.xlu1 %440  ;;  %v543_v19 = vsub.s32 1, %v3303_v6 }
  0xa8   : > { %v453_v34 = vmul.f32 0.03125, %v438_v31  ;;  %v454_v35 = vmul.f32 0.03125, %v441_v32  ;;  %v466_v36 = vmul.f32 %v3259_v28, %v3259_v28  ;;  %v468_v37 = vmul.f32 %v3261_v29, %v3261_v29 }
  0xa9   : > { %v544_v32 = vrot.slane %v422_v16, %v543_v19 }
  0xaa   : > { %v3269_v38 = vsub.f32 %v418_v8, %v453_v34  ;;  %v3271_v39 = vsub.f32 %v419_v9, %v454_v35  ;;  %v476_v40 = vsel %vm423_vm0, %v466_v36, 0.0  ;;  %v482_v43 = vsel %vm423_vm0, %v468_v37, 0.0 }
  0xab   : > { %480 = vadd.xlane.f32.xlu0 %v479_v33  ;;  %477 = vadd.xlane.f32.xlu1 %v476_v40  ;;  %v444_v41 = vpop.xlane.xlu0 %443  ;;  %v447_v42 = vpop.xlane.xlu1 %446 }
  0xac   : > { %v455_v44 = vmul.f32 0.03125, %v444_v41  ;;  %v456_v45 = vmul.f32 0.03125, %v447_v42  ;;  %v469_v46 = vmul.f32 %v3269_v38, %v3269_v38  ;;  %v470_v47 = vmul.f32 %v3271_v39, %v3271_v39 }
  0xae   : > { %v3279_v48 = vsub.f32 %v420_v12, %v455_v44  ;;  %v3281_v49 = vsub.f32 %v421_v13, %v456_v45  ;;  %v485_v50 = vsel %vm423_vm0, %v469_v46, 0.0  ;;  %v488_v51 = vsel %vm423_vm0, %v470_v47, 0.0 }
  0xaf   : > { %483 = vadd.xlane.f32.xlu1 %v482_v43  ;;  %486 = vadd.xlane.f32.xlu0 %v485_v50  ;;  %v531_v13 = vsub.s32 0, %v3303_v6 }
  0xb0   : > { %v471_v52 = vmul.f32 %v3279_v48, %v3279_v48  ;;  %v472_v53 = vmul.f32 %v3281_v49, %v3281_v49 }
  0xb1   : > { %v532_v24 = vrot.slane %v422_v16, %v531_v13 }
  0xb2   : > { %v491_v54 = vsel %vm423_vm0, %v471_v52, 0.0  ;;  %v494_v55 = vsel %vm423_vm0, %v472_v53, 0.0 }
  0xb3   : > { %489 = vadd.xlane.f32.xlu1 %v488_v51  ;;  %492 = vadd.xlane.f32.xlu0 %v491_v54 }
  0xb7   : > { %495 = vadd.xlane.f32.xlu1 %v494_v55 }
 0x134   : > { %v475_v62 = vpop.xlane.xlu0 %474 }
 0x135   : > { %v497_v63 = vmul.f32 0.03125, %v475_v62 }
 0x137   : > { %v505_v1 = vadd.f32 1e-05, %v497_v63 }
 0x138   : > { %v478_v2 = vpop.xlane.xlu1 %477  ;;  %v481_v3 = vpop.xlane.xlu0 %480 }
 0x139   : > { %3019 = vrsqrt.f32 %v505_v1  ;;  %v498_v4 = vmul.f32 0.03125, %v478_v2  ;;  %v499_v5 = vmul.f32 0.03125, %v481_v3 }
 0x13b   : > { %v506_v7 = vadd.f32 1e-05, %v498_v4  ;;  %v507_v8 = vadd.f32 1e-05, %v499_v5 }
 0x13c   : > { %v484_v9 = vpop.xlane.xlu1 %483  ;;  %v487_v10 = vpop.xlane.xlu0 %486 }
 0x13d   : > { %3021 = vrsqrt.f32 %v506_v7  ;;  %v500_v11 = vmul.f32 0.03125, %v484_v9  ;;  %v501_v12 = vmul.f32 0.03125, %v487_v10 }
 0x13e   : > { %3023 = vrsqrt.f32 %v507_v8 }
 0x13f   : > { %v508_v14 = vadd.f32 1e-05, %v500_v11  ;;  %v509_v15 = vadd.f32 1e-05, %v501_v12 }
 0x140   : > { %v490_v17 = vpop.xlane.xlu1 %489  ;;  %v493_v18 = vpop.xlane.xlu0 %492 }
 0x141   : > { %3025 = vrsqrt.f32 %v508_v14  ;;  %v502_v22 = vmul.f32 0.03125, %v490_v17  ;;  %v503_v23 = vmul.f32 0.03125, %v493_v18 }
 0x142   : > { %3027 = vrsqrt.f32 %v509_v15 }
 0x143   : > { %v3020_v25 = vpop.eup %3019  ;;  %v510_v26 = vadd.f32 1e-05, %v502_v22  ;;  %v511_v27 = vadd.f32 1e-05, %v503_v23 }
 0x144   : > { %v496_v30 = vpop.xlane.xlu1 %495  ;;  %v521_v31 = vmul.f32 %v3020_v25, %v3251_v20 }
 0x145   : > { %3029 = vrsqrt.f32 %v510_v26  ;;  %v504_v33 = vmul.f32 0.03125, %v496_v30 }
 0x146   : > { %3031 = vrsqrt.f32 %v511_v27  ;;  %v533_v34 = vmul.f32 %v532_v24, %v521_v31 }
 0x147   : > { %v3022_v35 = vpop.eup %3021  ;;  %v512_v36 = vadd.f32 1e-05, %v504_v33 }
 0x148   : > { %v3024_v37 = vpop.eup %3023  ;;  %v545_v40 = vadd.f32 %v544_v32, %v533_v34  ;;  %v522_v41 = vmul.f32 %v3022_v35, %v3259_v28 }
 0x149   : > { %3033 = vrsqrt.f32 %v512_v36  ;;  %v523_v42 = vmul.f32 %v3024_v37, %v3253_v21 }
 0x14a   : > { %2586 = vmatprep.mubr.msk.f32.mxu0 %vm423_vm0, %v545_v40  ;;  %v534_v43 = vmul.f32 %v532_v24, %v522_v41 }
 0x14b   : > { %v3026_v20 = vpop.eup %3025  ;;  %v535_v44 = vmul.f32 %v532_v24, %v523_v42 }
 0x14c   : > { %v3028_v45 = vpop.eup %3027  ;;  %v546_v46 = vadd.f32 %v544_v32, %v534_v43  ;;  %v524_v47 = vmul.f32 %v3026_v20, %v3261_v29  ;;  %v698_v20 = vld [vmem:[%s3852_s1 + $0x8] sm:$0xff] }
 0x14d   : > { %v547_v50 = vadd.f32 %v544_v32, %v535_v44  ;;  %v525_v51 = vmul.f32 %v3028_v45, %v3269_v38  ;;  %v697_v44 = vld [vmem:[%s3852_s1] sm:$0xff] }
 0x14e   : > { %2587 = vmatmul.mubr.msk.f32.vlgmr.msra.gmra.mrb[0].mxu0 %vm423_vm0, %v546_v46  ;;  %v536_v52 = vmul.f32 %v532_v24, %v524_v47 }
 0x14f   : > { %v3030_v53 = vpop.eup %3029  ;;  %2589 = vmatprep.mubr.msk.f32.mxu0 %vm423_vm0, %v547_v50  ;;  %v537_v28 = vmul.f32 %v532_v24, %v525_v51  ;;  %v700_v51 = vld [vmem:[%s3852_s1 + $0x18] sm:$0xff] }
 0x150   : > { %v3032_v21 = vpop.eup %3031  ;;  %v548_v54 = vadd.f32 %v544_v32, %v536_v52  ;;  %v526_v55 = vmul.f32 %v3030_v53, %v3271_v39 }
 0x151   : > { %v549_v56 = vadd.f32 %v544_v32, %v537_v28  ;;  %v527_v57 = vmul.f32 %v3032_v21, %v3279_v48  ;;  %v2350_v48 = vld [vmem:[%s3854_s3] ss:$0 sm:$0xff] }
 0x152   : > { %2590 = vmatmul.mubr.msk.f32.gmra.mrb[2].mxu0 %vm423_vm0, %v548_v54  ;;  %v538_v29 = vmul.f32 %v532_v24, %v526_v55  ;;  %v699_v55 = vld [vmem:[%s3852_s1 + $0x10] sm:$0xff] }
 0x153   : > { %v3034_v58 = vpop.eup %3033  ;;  %2592 = vmatprep.mubr.msk.f32.mxu0 %vm423_vm0, %v549_v56  ;;  %v539_v38 = vmul.f32 %v532_v24, %v527_v57  ;;  %v702_v56 = vld [vmem:[%s3852_s1 + $0x28] sm:$0xff] }
 0x154   : > { %v550_v59 = vadd.f32 %v544_v32, %v538_v29  ;;  %v528_v60 = vmul.f32 %v3034_v58, %v3281_v49 }
 0x155   : > { %v551_v61 = vadd.f32 %v544_v32, %v539_v38 }
 0x156   : > { %2593 = vmatmul.mubr.msk.f32.gmra.mrb[4].mxu0 %vm423_vm0, %v550_v59  ;;  %v540_v62 = vmul.f32 %v532_v24, %v528_v60  ;;  %v701_v60 = vld [vmem:[%s3852_s1 + $0x20] sm:$0xff] }
 0x157   : > { %2595 = vmatprep.mubr.msk.f32.mxu0 %vm423_vm0, %v551_v61  ;;  %v704_v61 = vld [vmem:[%s3852_s1 + $0x38] sm:$0xff] }
 0x158   : > { %v552_v39 = vadd.f32 %v544_v32, %v540_v62 }
 0x15a   : > { %2596 = vmatmul.mubr.msk.f32.gmra.mrb[6].mxu0 %vm423_vm0, %v552_v39 }
 0x221   : > { %v2588_v63 = vpop.f32.mrb[0].mxu0 }
 0x222   : > { %v3333_v0 = vadd.f32 %v2588_v63, %v2350_v48  ;;  %v654_v1 = vpop.f32.mrb[1].mxu0 }
 0x223   : > { %v3335_v2 = vadd.f32 %v2350_v48, %v654_v1 }
 0x225   : > { %v2591_v49 = vpop.f32.mrb[2].mxu0  ;;  %2614 = vmatprep.mubr.msk.f32.mxu1 %vm729_vm1, %v3335_v2  ;;  %v3341_v3 = vpack.i.bf16 %v3333_v0, %v3335_v2 }
 0x226   : > { %v3343_v4 = vadd.f32 %v2591_v49, %v2350_v48  ;;  %v664_v5 = vpop.f32.mrb[3].mxu0 }
 0x227   : > { %v3345_v7 = vadd.f32 %v2350_v48, %v664_v5  ;;  %2940 = vrot.lane.b32.xlu0 %v3341_v3, %s3147_s24  ;;  %v703_v5 = vld [vmem:[%s3852_s1 + $0x30] sm:$0xff] }
 0x229   : > { %v2594_v8 = vpop.f32.mrb[4].mxu0  ;;  %v3350_v9 = vpack.i.bf16 %v3343_v4, %v3345_v7 }
 0x22a   : > { %v3352_v10 = vadd.f32 %v2594_v8, %v2350_v48  ;;  %v674_v11 = vpop.f32.mrb[5].mxu0 }
 0x22b   : > { %v3354_v12 = vadd.f32 %v2350_v48, %v674_v11  ;;  %2945 = vrot.lane.b32.xlu1 %v3350_v9, %s3147_s24 }
 0x22d   : > { %v2597_v14 = vpop.f32.mrb[6].mxu0  ;;  %v3359_v15 = vpack.i.bf16 %v3352_v10, %v3354_v12 }
 0x22e   : > { %v3361_v16 = vadd.f32 %v2597_v14, %v2350_v48  ;;  %v684_v17 = vpop.f32.mrb[7].mxu0 }
 0x22f   : > { %v3363_v18 = vadd.f32 %v2350_v48, %v684_v17  ;;  %2950 = vrot.lane.b32.xlu1 %v3359_v15, %s3147_s24 }
 0x231   : > { %v3368_v22 = vpack.i.bf16 %v3361_v16, %v3363_v18 }
 0x233   : > { %2955 = vrot.lane.b32.xlu1 %v3368_v22, %s3147_s24 }
 0x299   : > { %v2941_v23 = vpop.permute.xlu0 %2940 }
 0x29a   : > { %v2943_v24 = vunpack.i.h.bf16 %v2941_v23  ;;  %v2942_v25 = vunpack.i.l.bf16 %v2941_v23 }
 0x29c   : > { %v2798_v27 = vpack.c.bf16 %v2943_v24, %v2942_v25 }
 0x29d   : > { %v2946_v30 = vpop.permute.xlu1 %2945 }
 0x29e   : > { %v2948_v31 = vunpack.i.h.bf16 %v2946_v30  ;;  %v2947_v32 = vunpack.i.l.bf16 %v2946_v30  ;;  %2800 = vmatprep.subr.msk.bf16.mxu1 %vm3373_vm2, %v2798_v27 }
 0x29f   : > { %2803 = vmatpush3.bf16.xpose.msk.msra.mxu1 %vm3373_vm2, %v2798_v27 }
 0x2a0   : > { %v2804_v33 = vpack.c.bf16 %v2948_v31, %v2947_v32 }
 0x2a1   : > { %v2951_v34 = vpop.permute.xlu1 %2950 }
 0x2a2   : > { %v2953_v35 = vunpack.i.h.bf16 %v2951_v34  ;;  %v2952_v36 = vunpack.i.l.bf16 %v2951_v34  ;;  %2806 = vmatprep.subr.msk.bf16.mxu1 %vm3373_vm2, %v2804_v33 }
 0x2a4   : > { %v2810_v37 = vpack.c.bf16 %v2953_v35, %v2952_v36 }
 0x2a5   : > { %v2956_v40 = vpop.permute.xlu1 %2955 }
 0x2a6   : > { %v2958_v41 = vunpack.i.h.bf16 %v2956_v40  ;;  %v2957_v42 = vunpack.i.l.bf16 %v2956_v40 }
 0x2a7   : > { %2809 = vmatpush3.bf16.xpose.msk.msra.mxu1 %vm3373_vm2, %v2804_v33 }
 0x2a8   : > { %2812 = vmatprep.subr.msk.bf16.mxu1 %vm3373_vm2, %v2810_v37  ;;  %v2816_v43 = vpack.c.bf16 %v2958_v41, %v2957_v42 }
 0x2af   : > { %2815 = vmatpush3.bf16.xpose.msk.msra.mxu1 %vm3373_vm2, %v2810_v37 }
 0x2b0   : > { %2818 = vmatprep.subr.msk.bf16.mxu1 %vm3373_vm2, %v2816_v43 }
 0x2b7   : > { %2821 = vmatpush3.bf16.xpose.msk.msra.mxu1 %vm3373_vm2, %v2816_v43 }
 0x2be   : > { %2615 = vmatmul.mubr.msk.f32.vlgmr.msra.gmra.mrb[0].mxu1 %vm729_vm1, %v3333_v0 }
 0x2bf   : > { %2617 = vmatprep.mubr.msk.f32.mxu1 %vm729_vm1, %v3345_v7 }
 0x2c2   : > { %2618 = vmatmul.mubr.msk.f32.gmra.mrb[2].mxu1 %vm729_vm1, %v3343_v4 }
 0x2c3   : > { %2620 = vmatprep.mubr.msk.f32.mxu1 %vm729_vm1, %v3354_v12 }
 0x2c6   : > { %2621 = vmatmul.mubr.msk.f32.gmra.mrb[4].mxu1 %vm729_vm1, %v3352_v10 }
 0x2c7   : > { %2623 = vmatprep.mubr.msk.f32.mxu1 %vm729_vm1, %v3363_v18 }
 0x2ca   : > { %2624 = vmatmul.mubr.msk.f32.gmra.mrb[6].mxu1 %vm729_vm1, %v3361_v16 }
 0x391   : > { %v2616_v45 = vpop.f32.mrb[0].mxu1 }
 0x392   : > { %v834_v46 = vadd.f32 %v2616_v45, %v698_v20  ;;  %v828_v47 = vpop.f32.mrb[1].mxu1 }
 0x393   : > { %v829_v50 = vadd.f32 %v828_v47, %v697_v44 }
 0x394   : > { %v871_v52 = vsel %vm867_vm3, %v834_v46, -inf }
 0x395   : > { %872 = vmax.xlane.f32.xlu1 %v871_v52  ;;  %v2619_v53 = vpop.f32.mrb[2].mxu1  ;;  %v868_v28 = vsel %vm867_vm3, %v829_v50, -inf }
 0x396   : > { %v844_v21 = vadd.f32 %v2619_v53, %v700_v51  ;;  %v838_v54 = vpop.f32.mrb[3].mxu1  ;;  %869 = vmax.xlane.f32.xlu0 %v868_v28 }
 0x397   : > { %v839_v29 = vadd.f32 %v838_v54, %v699_v55 }
 0x398   : > { %v877_v57 = vsel %vm867_vm3, %v844_v21, -inf }
 0x399   : > { %v2622_v58 = vpop.f32.mrb[4].mxu1  ;;  %v874_v63 = vsel %vm867_vm3, %v839_v29, -inf }
 0x39a   : > { %v854_v38 = vadd.f32 %v2622_v58, %v702_v56  ;;  %v848_v59 = vpop.f32.mrb[5].mxu1  ;;  %878 = vmax.xlane.f32.xlu0 %v877_v57 }
 0x39b   : > { %v849_v39 = vadd.f32 %v848_v59, %v701_v60 }
 0x39c   : > { %v883_v62 = vsel %vm867_vm3, %v854_v38, -inf }
 0x39d   : > { %884 = vmax.xlane.f32.xlu1 %v883_v62  ;;  %v2625_v48 = vpop.f32.mrb[6].mxu1  ;;  %v880_v14 = vsel %vm867_vm3, %v849_v39, -inf }
 0x39e   : > { %v3433_v1 = vadd.f32 %v2625_v48, %v704_v61  ;;  %v858_v49 = vpop.f32.mrb[7].mxu1  ;;  %875 = vmax.xlane.f32.xlu0 %v874_v63 }
 0x39f   : > { %v3440_v11 = vadd.f32 %v858_v49, %v703_v5 }
 0x3a0   : > { %v889_v8 = vsel %vm867_vm3, %v3433_v1, -inf }
 0x3a1   : > { %890 = vmax.xlane.f32.xlu1 %v889_v8  ;;  %v886_v17 = vsel %vm867_vm3, %v3440_v11, -inf }
 0x3a2   : > { %881 = vmax.xlane.f32.xlu0 %v880_v14 }
 0x3a6   : > { %887 = vmax.xlane.f32.xlu0 %v886_v17 }
 0x3b2   : > { %2965 = vrot.lane.b32.xlu1 %v3350_v9, %s3148_s28 }
 0x3b6   : > { %2970 = vrot.lane.b32.xlu1 %v3359_v15, %s3148_s28 }
 0x3ba   : > { %2975 = vrot.lane.b32.xlu1 %v3368_v22, %s3148_s28 }
 0x3bc   : > { %2960 = vrot.lane.b32.xlu0 %v3341_v3, %s3148_s28 }
 0x3be   : > { %2985 = vrot.lane.b32.xlu1 %v3350_v9, %s3149_s29 }
 0x3c0   : > { %2980 = vrot.lane.b32.xlu0 %v3341_v3, %s3149_s29 }
 0x422   : > { %v873_v23 = vpop.xlane.xlu1 %872 }
 0x423   : > { %v893_v24 = vsub.f32 %v834_v46, %v873_v23  ;;  %v870_v25 = vpop.xlane.xlu0 %869 }
 0x424   : > { %v892_v27 = vsub.f32 %v829_v50, %v870_v25 }
 0x425   : > { %v902_v30 = vmul.f32 1.442695, %v893_v24 }
 0x426   : > { %v900_v31 = vmul.f32 1.442695, %v892_v27 }
 0x427   : > { %3035 = vpow2.f32 %v902_v30  ;;  %v879_v32 = vpop.xlane.xlu0 %878 }
 0x428   : > { %3037 = vpow2.f32 %v900_v31  ;;  %v895_v33 = vsub.f32 %v844_v21, %v879_v32 }
 0x42a   : > { %v906_v34 = vmul.f32 1.442695, %v895_v33  ;;  %v885_v35 = vpop.xlane.xlu1 %884 }
 0x42b   : > { %v897_v36 = vsub.f32 %v854_v38, %v885_v35  ;;  %v876_v37 = vpop.xlane.xlu0 %875 }
 0x42c   : > { %3039 = vpow2.f32 %v906_v34  ;;  %v894_v40 = vsub.f32 %v839_v29, %v876_v37 }
 0x42d   : > { %v910_v41 = vmul.f32 1.442695, %v897_v36 }
 0x42e   : > { %v904_v42 = vmul.f32 1.442695, %v894_v40  ;;  %v891_v43 = vpop.xlane.xlu1 %890 }
 0x42f   : > { %v882_v20 = vpop.xlane.xlu0 %881  ;;  %v899_v32 = vsub.f32 %v3433_v1, %v891_v43 }
 0x430   : > { %3041 = vpow2.f32 %v904_v42  ;;  %v896_v44 = vsub.f32 %v849_v39, %v882_v20 }
 0x431   : > { %v3453_v45 = vpop.eup %3035  ;;  %3043 = vpow2.f32 %v910_v41  ;;  %v914_v33 = vmul.f32 1.442695, %v899_v32 }
 0x432   : > { %v3455_v46 = vpop.eup %3037  ;;  %v908_v47 = vmul.f32 1.442695, %v896_v44  ;;  %v2966_v50 = vpop.permute.xlu1 %2965  ;;  %v919_v51 = vsel %vm867_vm3, %v3453_v45, 0.0 }
 0x433   : > { %920 = vadd.xlane.f32.xlu1 %v919_v51  ;;  %v888_v52 = vpop.xlane.xlu0 %887  ;;  %v916_v53 = vsel %vm867_vm3, %v3455_v46, 0.0  ;;  %v2968_v56 = vunpack.i.h.bf16 %v2966_v50  ;;  %v2967_v57 = vunpack.i.l.bf16 %v2966_v50 }
 0x434   : > { %917 = vadd.xlane.f32.xlu0 %v916_v53  ;;  %3045 = vpow2.f32 %v908_v47  ;;  %v898_v34 = vsub.f32 %v3440_v11, %v888_v52 }
 0x435   : > { %v2826_v62 = vpack.c.bf16 %v2968_v56, %v2967_v57  ;;  %3047 = vpow2.f32 %v914_v33 }
 0x436   : > { %v3461_v28 = vpop.eup %3039  ;;  %v2971_v21 = vpop.permute.xlu1 %2970  ;;  %v912_v35 = vmul.f32 1.442695, %v898_v34 }
 0x437   : > { %v2961_v54 = vpop.permute.xlu0 %2960  ;;  %v925_v55 = vsel %vm867_vm3, %v3461_v28, 0.0  ;;  %v2973_v39 = vunpack.i.h.bf16 %v2971_v21  ;;  %v2972_v48 = vunpack.i.l.bf16 %v2971_v21 }
 0x438   : > { %v2963_v29 = vunpack.i.h.bf16 %v2961_v54  ;;  %v2962_v58 = vunpack.i.l.bf16 %v2961_v54  ;;  %926 = vadd.xlane.f32.xlu1 %v925_v55  ;;  %3049 = vpow2.f32 %v912_v35  ;;  %v2384_v35 = vld [vmem:[%s3852_s1 + $0x48] sm:$0xff] }
 0x439   : > { %v2830_v8 = vpack.c.bf16 %v2973_v39, %v2972_v48 }
 0x43a   : > { %v3465_v38 = vpop.eup %3041  ;;  %v2822_v59 = vpack.c.bf16 %v2963_v29, %v2962_v58  ;;  %v2976_v63 = vpop.permute.xlu1 %2975 }
 0x43b   : > { %v922_v60 = vsel %vm867_vm3, %v3465_v38, 0.0  ;;  %v3469_v61 = vpop.eup %3043  ;;  %v2978_v14 = vunpack.i.h.bf16 %v2976_v63  ;;  %v2977_v17 = vunpack.i.l.bf16 %v2976_v63  ;;  %v2981_v23 = vpop.permute.xlu0 %2980 }
 0x43c   : > { %923 = vadd.xlane.f32.xlu0 %v922_v60  ;;  %2823 = vmatprep.subr.bf16.mxu0 %v2822_v59  ;;  %v931_v49 = vsel %vm867_vm3, %v3469_v61, 0.0  ;;  %v2983_v27 = vunpack.i.h.bf16 %v2981_v23  ;;  %v2982_v30 = vunpack.i.l.bf16 %v2981_v23 }
 0x43d   : > { %2825 = vmatpush3.bf16.msra.mxu0 %v2822_v59  ;;  %v2834_v25 = vpack.c.bf16 %v2978_v14, %v2977_v17 }
 0x43e   : > { %2827 = vmatprep.subr.bf16.mxu0 %v2826_v62  ;;  %v3473_v5 = vpop.eup %3045  ;;  %v2838_v31 = vpack.c.bf16 %v2983_v27, %v2982_v30 }
 0x43f   : > { %v928_v24 = vsel %vm867_vm3, %v3473_v5, 0.0 }
 0x440   : > { %932 = vadd.xlane.f32.xlu0 %v931_v49 }
 0x441   : > { %2829 = vmatpush3.bf16.msra.mxu0 %v2826_v62 }
 0x442   : > { %2831 = vmatprep.subr.bf16.mxu0 %v2830_v8 }
 0x444   : > { %929 = vadd.xlane.f32.xlu0 %v928_v24 }
 0x445   : > { %2833 = vmatpush3.bf16.msra.mxu0 %v2830_v8 }
 0x446   : > { %2835 = vmatprep.subr.bf16.mxu0 %v2834_v25 }
 0x449   : > { %2995 = vrot.lane.b32.xlu1 %v3368_v22, %s3149_s29  ;;  %2837 = vmatpush3.bf16.msra.mxu0 %v2834_v25 }
 0x44a   : > { %2840 = vmatprep.subr.msk.bf16.mxu0 %vm3373_vm2, %v2838_v31 }
 0x44d   : > { %1120 = vrot.lane.b32.xlu1 %v3333_v0, %s3150_s30  ;;  %v3490_v0 = vpop.eup %3047 }
 0x44e   : > { %v937_v36 = vsel %vm867_vm3, %v3490_v0, 0.0  ;;  %v3494_v1 = vpop.eup %3049 }
 0x45a   : > { %2990 = vrot.lane.b32.xlu0 %v3359_v15, %s3149_s29 }
 0x45e   : > { %1118 = vrot.lane.b32.xlu0 %v3335_v2, %s3150_s30  ;;  %v934_v2 = vsel %vm867_vm3, %v3494_v1, 0.0 }
 0x462   : > { %1122 = vrot.lane.b32.xlu0 %v3345_v7, %s3150_s30  ;;  %v2986_v7 = vpop.permute.xlu1 %2985 }
 0x463   : > { %v2988_v42 = vunpack.i.h.bf16 %v2986_v7  ;;  %v2987_v43 = vunpack.i.l.bf16 %v2986_v7 }
 0x466   : > { %1126 = vrot.lane.b32.xlu0 %v3354_v12, %s3150_s30 }
 0x46a   : > { %1130 = vrot.lane.b32.xlu0 %v3363_v18, %s3150_s30 }
 0x471   : > { %938 = vadd.xlane.f32.xlu1 %v937_v36 }
 0x475   : > { %935 = vadd.xlane.f32.xlu1 %v934_v2 }
 0x486   : > { %1124 = vrot.lane.b32.xlu1 %v3343_v4, %s3150_s30 }
 0x48a   : > { %1128 = vrot.lane.b32.xlu1 %v3352_v10, %s3150_s30 }
 0x48e   : > { %1132 = vrot.lane.b32.xlu1 %v3361_v16, %s3150_s30  ;;  %v2844_v16 = vpack.c.bf16 %v2988_v42, %v2987_v43  ;;  %v2385_v42 = vld [vmem:[%s3852_s1 + $0x50] sm:$0xff]  ;;  %v2388_v43 = vld [vmem:[%s3852_s1 + $0x68] sm:$0xff] }
 0x4c0   : > { %v921_v12 = vpop.xlane.xlu1 %920 }
 0x4c1   : > { %3051 = vrcp.f32 %v921_v12  ;;  %v918_v18 = vpop.xlane.xlu0 %917  ;;  %v2386_v12 = vld [vmem:[%s3852_s1 + $0x58] sm:$0xff] }
 0x4c2   : > { %3053 = vrcp.f32 %v918_v18 }
 0x4c5   : > { %v927_v11 = vpop.xlane.xlu1 %926 }
 0x4c6   : > { %3055 = vrcp.f32 %v927_v11 }
 0x4c9   : > { %v924_v37 = vpop.xlane.xlu0 %923  ;;  %v2996_v54 = vpop.permute.xlu1 %2995 }
 0x4ca   : > { %3057 = vrcp.f32 %v924_v37  ;;  %v2998_v57 = vunpack.i.h.bf16 %v2996_v54  ;;  %v2997_v29 = vunpack.i.l.bf16 %v2996_v54  ;;  %v2389_v54 = vld [vmem:[%s3852_s1 + $0x70] sm:$0xff] }
 0x4cb   : > { %v3052_v40 = vpop.eup %3051 }
 0x4cc   : > { %v3054_v41 = vpop.eup %3053  ;;  %v949_v10 = vmul.f32 %v3052_v40, %v3453_v45 }
 0x4cd   : > { %v933_v20 = vpop.xlane.xlu0 %932  ;;  %v948_v4 = vmul.f32 %v3054_v41, %v3455_v46  ;;  %v1121_v59 = vpop.permute.xlu1 %1120 }
 0x4ce   : > { %3059 = vrcp.f32 %v933_v20 }
 0x4cf   : > { %2642 = vmatprep.mubr.msk.f32.mxu0 %vm867_vm3, %v948_v4 }
 0x4d0   : > { %2643 = vmatmul.mubr.msk.f32.vlgmr.msra.gmra.mrb[8].mxu0 %vm867_vm3, %v949_v10  ;;  %v3056_v47 = vpop.eup %3055 }
 0x4d1   : > { %2843 = vmatpush3.bf16.xpose.msk.msra.mxu0 %vm3373_vm2, %v2838_v31  ;;  %v930_v44 = vpop.xlane.xlu0 %929  ;;  %v951_v53 = vmul.f32 %v3056_v47, %v3461_v28  ;;  %v2387_v47 = vld [vmem:[%s3852_s1 + $0x60] sm:$0xff] }
 0x4d2   : > { %3061 = vrcp.f32 %v930_v44  ;;  %2846 = vmatprep.subr.msk.bf16.mxu0 %vm3373_vm2, %v2844_v16 }
 0x4d4   : > { %v3058_v50 = vpop.eup %3057 }
 0x4d5   : > { %v2991_v51 = vpop.permute.xlu0 %2990  ;;  %v950_v46 = vmul.f32 %v3058_v50, %v3465_v38  ;;  %v2856_v38 = vpack.c.bf16 %v2998_v57, %v2997_v29  ;;  %v2390_v50 = vld [vmem:[%s3852_s1 + $0x78] sm:$0xff] }
 0x4d6   : > { %v2993_v45 = vunpack.i.h.bf16 %v2991_v51  ;;  %v2992_v52 = vunpack.i.l.bf16 %v2991_v51 }
 0x4d7   : > { %2645 = vmatprep.mubr.msk.f32.mxu0 %vm867_vm3, %v950_v46 }
 0x4d8   : > { %v2850_v21 = vpack.c.bf16 %v2993_v45, %v2992_v52  ;;  %2646 = vmatmul.mubr.msk.f32.gmra.mrb[10].mxu0 %vm867_vm3, %v951_v53  ;;  %v3060_v55 = vpop.eup %3059 }
 0x4d9   : > { %2849 = vmatpush3.bf16.xpose.msk.msra.mxu0 %vm3373_vm2, %v2844_v16  ;;  %v953_v28 = vmul.f32 %v3060_v55, %v3469_v61  ;;  %v1119_v61 = vpop.permute.xlu0 %1118 }
 0x4da   : > { %2852 = vmatprep.subr.msk.bf16.mxu0 %vm3373_vm2, %v2850_v21 }
 0x4dc   : > { %v3062_v56 = vpop.eup %3061 }
 0x4dd   : > { %v952_v58 = vmul.f32 %v3062_v56, %v3473_v5  ;;  %v1123_v5 = vpop.permute.xlu0 %1122 }
 0x4df   : > { %2648 = vmatprep.mubr.msk.f32.mxu0 %vm867_vm3, %v952_v58 }
 0x4e0   : > { %2649 = vmatmul.mubr.msk.f32.gmra.mrb[12].mxu0 %vm867_vm3, %v953_v28 }
 0x4e1   : > { %2855 = vmatpush3.bf16.xpose.msk.msra.mxu0 %vm3373_vm2, %v2850_v21  ;;  %v1127_v8 = vpop.permute.xlu0 %1126 }
 0x4e2   : > { %2858 = vmatprep.subr.msk.bf16.mxu0 %vm3373_vm2, %v2856_v38 }
 0x4e5   : > { %v1131_v17 = vpop.permute.xlu0 %1130 }
 0x4e9   : > { %2861 = vmatpush3.bf16.xpose.msk.msra.mxu0 %vm3373_vm2, %v2856_v38 }
 0x4fe   : > { %v939_v60 = vpop.xlane.xlu1 %938 }
 0x4ff   : > { %3063 = vrcp.f32 %v939_v60 }
 0x502   : > { %v936_v62 = vpop.xlane.xlu1 %935 }
 0x503   : > { %3065 = vrcp.f32 %v936_v62 }
 0x506   : > { %v1125_v26 = vpop.permute.xlu1 %1124 }
 0x509   : > { %v3064_v39 = vpop.eup %3063 }
 0x50a   : > { %v955_v49 = vmul.f32 %v3064_v39, %v3490_v0  ;;  %v1129_v14 = vpop.permute.xlu1 %1128  ;;  %v2383_v0 = vld [vmem:[%s3852_s1 + $0x40] sm:$0xff] }
 0x50d   : > { %v3066_v48 = vpop.eup %3065 }
 0x50e   : > { %v954_v63 = vmul.f32 %v3066_v48, %v3494_v1  ;;  %v1133_v23 = vpop.permute.xlu1 %1132 }
 0x510   : > { %2651 = vmatprep.mubr.msk.f32.mxu0 %vm867_vm3, %v954_v63 }
 0x511   : > { %2652 = vmatmul.mubr.msk.f32.gmra.mrb[14].mxu0 %vm867_vm3, %v955_v49 }
 0x512   : > { %2670 = vmatprep.mubr.msk.f32.mxu0 %vm729_vm1, %v1119_v61 }
 0x515   : > { %2671 = vmatmul.mubr.msk.f32.vlgmr.msra.gmra.mrb[16].mxu0 %vm729_vm1, %v1121_v59 }
 0x516   : > { %2673 = vmatprep.mubr.msk.f32.mxu0 %vm729_vm1, %v1123_v5 }
 0x519   : > { %2674 = vmatmul.mubr.msk.f32.gmra.mrb[18].mxu0 %vm729_vm1, %v1125_v26 }
 0x51a   : > { %2676 = vmatprep.mubr.msk.f32.mxu0 %vm729_vm1, %v1127_v8 }
 0x51d   : > { %2677 = vmatmul.mubr.msk.f32.gmra.mrb[20].mxu0 %vm729_vm1, %v1129_v14 }
 0x51e   : > { %2679 = vmatprep.mubr.msk.f32.mxu0 %vm729_vm1, %v1131_v17 }
 0x521   : > { %2680 = vmatmul.mubr.msk.f32.gmra.mrb[22].mxu0 %vm729_vm1, %v1133_v23 }
 0x5a3   : > { %v3539_v24 = vpop.f32.mrb[8].mxu0 }
 0x5a4   : > { %v3541_v25 = vpop.f32.mrb[9].mxu0 }
 0x5ab   : > { %v3543_v27 = vpop.f32.mrb[10].mxu0 }
 0x5ac   : > { %v3545_v30 = vpop.f32.mrb[11].mxu0 }
 0x5b3   : > { %v3547_v31 = vpop.f32.mrb[12].mxu0 }
 0x5b4   : > { %v3549_v32 = vpop.f32.mrb[13].mxu0 }
 0x5e4   : > { %v3551_v33 = vpop.f32.mrb[14].mxu0 }
 0x5e5   : > { %v3553_v34 = vpop.f32.mrb[15].mxu0 }
 0x5e8   : > { %v2672_v36 = vpop.f32.mrb[16].mxu0 }
 0x5e9   : > { %v1254_v1 = vadd.f32 %v2672_v36, %v2384_v35  ;;  %v1248_v2 = vpop.f32.mrb[17].mxu0 }
 0x5ea   : > { %v1249_v7 = vadd.f32 %v2383_v0, %v1248_v2 }
 0x5eb   : > { %v1290_v18 = vsel %vm867_vm3, %v1254_v1, -inf }
 0x5ec   : > { %1291 = vmax.xlane.f32.xlu1 %v1290_v18  ;;  %v2675_v11 = vpop.f32.mrb[18].mxu0  ;;  %v1287_v37 = vsel %vm867_vm3, %v1249_v7, -inf }
 0x5ed   : > { %v1264_v40 = vadd.f32 %v2675_v11, %v2386_v12  ;;  %v1258_v41 = vpop.f32.mrb[19].mxu0  ;;  %1288 = vmax.xlane.f32.xlu0 %v1287_v37 }
 0x5ee   : > { %v1259_v4 = vadd.f32 %v2385_v42, %v1258_v41 }
 0x5ef   : > { %v1296_v20 = vsel %vm867_vm3, %v1264_v40, -inf }
 0x5f0   : > { %v2678_v10 = vpop.f32.mrb[20].mxu0  ;;  %v1293_v52 = vsel %vm867_vm3, %v1259_v4, -inf }
 0x5f1   : > { %v1274_v16 = vadd.f32 %v2678_v10, %v2388_v43  ;;  %v1268_v44 = vpop.f32.mrb[21].mxu0  ;;  %1297 = vmax.xlane.f32.xlu0 %v1296_v20 }
 0x5f2   : > { %v1269_v46 = vadd.f32 %v2387_v47, %v1268_v44 }
 0x5f3   : > { %v1302_v51 = vsel %vm867_vm3, %v1274_v16, -inf }
 0x5f4   : > { %1303 = vmax.xlane.f32.xlu1 %v1302_v51  ;;  %v2681_v45 = vpop.f32.mrb[22].mxu0  ;;  %v1299_v57 = vsel %vm867_vm3, %v1269_v46, -inf }
 0x5f5   : > { %v1284_v53 = vadd.f32 %v2681_v45, %v2390_v50  ;;  %v1278_v21 = vpop.f32.mrb[23].mxu0  ;;  %1294 = vmax.xlane.f32.xlu0 %v1293_v52 }
 0x5f6   : > { %v1279_v56 = vadd.f32 %v2389_v54, %v1278_v21 }
 0x5f7   : > { %v1308_v55 = vsel %vm867_vm3, %v1284_v53, -inf }
 0x5f8   : > { %1309 = vmax.xlane.f32.xlu1 %v1308_v55  ;;  %v1305_v29 = vsel %vm867_vm3, %v1279_v56, -inf }
 0x5f9   : > { %1300 = vmax.xlane.f32.xlu0 %v1299_v57 }
 0x5fd   : > { %1306 = vmax.xlane.f32.xlu0 %v1305_v29 }
 0x609   : > { %3005 = vrot.lane.b32.xlu1 %v3350_v9, %s3151_s15 }
 0x613   : > { %3000 = vrot.lane.b32.xlu0 %v3341_v3, %s3151_s15 }
 0x679   : > { %v1292_v58 = vpop.xlane.xlu1 %1291 }
 0x67a   : > { %v1312_v28 = vsub.f32 %v1254_v1, %v1292_v58  ;;  %v1289_v38 = vpop.xlane.xlu0 %1288 }
 0x67b   : > { %v1311_v59 = vsub.f32 %v1249_v7, %v1289_v38 }
 0x67c   : > { %v1321_v60 = vmul.f32 1.442695, %v1312_v28 }
 0x67d   : > { %v1319_v62 = vmul.f32 1.442695, %v1311_v59 }
 0x67e   : > { %3067 = vpow2.f32 %v1321_v60  ;;  %v1298_v61 = vpop.xlane.xlu0 %1297 }
 0x67f   : > { %3069 = vpow2.f32 %v1319_v62  ;;  %v1314_v39 = vsub.f32 %v1264_v40, %v1298_v61 }
 0x681   : > { %v1325_v48 = vmul.f32 1.442695, %v1314_v39  ;;  %v1304_v63 = vpop.xlane.xlu1 %1303 }
 0x682   : > { %v1316_v49 = vsub.f32 %v1274_v16, %v1304_v63  ;;  %v1295_v5 = vpop.xlane.xlu0 %1294 }
 0x683   : > { %3071 = vpow2.f32 %v1325_v48  ;;  %v1313_v26 = vsub.f32 %v1259_v4, %v1295_v5  ;;  %v696_v5 = vld [vmem:[%s3855_s4 + $0x18] sm:$0xff] }
 0x684   : > { %v1329_v9 = vmul.f32 1.442695, %v1316_v49  ;;  %v695_v49 = vld [vmem:[%s3855_s4 + $0x10] sm:$0xff] }
 0x685   : > { %v1323_v8 = vmul.f32 1.442695, %v1313_v26  ;;  %v1310_v14 = vpop.xlane.xlu1 %1309 }
 0x686   : > { %3073 = vpow2.f32 %v1329_v9  ;;  %v1318_v3 = vsub.f32 %v1284_v53, %v1310_v14  ;;  %v1301_v17 = vpop.xlane.xlu0 %1300  ;;  %v2878_v14 = vpack.c.bf16 %v696_v5, %v695_v49 }
 0x687   : > { %3075 = vpow2.f32 %v1323_v8  ;;  %v1315_v23 = vsub.f32 %v1269_v46, %v1301_v17 }
 0x688   : > { %v3591_v35 = vpop.eup %3067  ;;  %v1333_v0 = vmul.f32 1.442695, %v1318_v3 }
 0x689   : > { %v3070_v36 = vpop.eup %3069  ;;  %v1327_v1 = vmul.f32 1.442695, %v1315_v23  ;;  %v1338_v2 = vsel %vm867_vm3, %v3591_v35, 0.0  ;;  %v3006_v37 = vpop.permute.xlu1 %3005 }
 0x68a   : > { %3077 = vpow2.f32 %v1333_v0  ;;  %1339 = vadd.xlane.f32.xlu1 %v1338_v2  ;;  %v1307_v7 = vpop.xlane.xlu0 %1306  ;;  %v1335_v12 = vsel %vm867_vm3, %v3070_v36, 0.0  ;;  %v3008_v10 = vunpack.i.h.bf16 %v3006_v37  ;;  %v3007_v16 = vunpack.i.l.bf16 %v3006_v37 }
 0x68b   : > { %3079 = vpow2.f32 %v1327_v1  ;;  %v1317_v18 = vsub.f32 %v1279_v56, %v1307_v7  ;;  %1336 = vadd.xlane.f32.xlu0 %v1335_v12 }
 0x68c   : > { %v2866_v45 = vpack.c.bf16 %v3008_v10, %v3007_v16 }
 0x68d   : > { %v3596_v11 = vpop.eup %3071  ;;  %v1331_v40 = vmul.f32 1.442695, %v1317_v18 }
 0x68e   : > { %v3001_v41 = vpop.permute.xlu0 %3000  ;;  %v1344_v42 = vsel %vm867_vm3, %v3596_v11, 0.0 }
 0x68f   : > { %3081 = vpow2.f32 %v1331_v40  ;;  %v3003_v43 = vunpack.i.h.bf16 %v3001_v41  ;;  %v3002_v20 = vunpack.i.l.bf16 %v3001_v41  ;;  %1345 = vadd.xlane.f32.xlu1 %v1344_v42  ;;  %v694_v42 = vld [vmem:[%s3855_s4 + $0x8] sm:$0xff] }
 0x690   : > { %v3600_v4 = vpop.eup %3073 }
 0x691   : > { %v3076_v44 = vpop.eup %3075  ;;  %v2862_v47 = vpack.c.bf16 %v3003_v43, %v3002_v20  ;;  %v1350_v50 = vsel %vm867_vm3, %v3600_v4, 0.0 }
 0x692   : > { %v1341_v51 = vsel %vm867_vm3, %v3076_v44, 0.0 }
 0x693   : > { %1351 = vadd.xlane.f32.xlu1 %v1350_v50  ;;  %1342 = vadd.xlane.f32.xlu0 %v1341_v51 }
 0x694   : > { %v3605_v46 = vpop.eup %3077  ;;  %2863 = vmatprep.subr.bf16.mxu1 %v2862_v47 }
 0x695   : > { %v3080_v52 = vpop.eup %3079  ;;  %2865 = vmatpush3.bf16.msra.mxu1 %v2862_v47  ;;  %v1356_v53 = vsel %vm867_vm3, %v3605_v46, 0.0 }
 0x696   : > { %2867 = vmatprep.subr.bf16.mxu1 %v2866_v45  ;;  %v1347_v21 = vsel %vm867_vm3, %v3080_v52, 0.0 }
 0x697   : > { %1357 = vadd.xlane.f32.xlu1 %v1356_v53  ;;  %1348 = vadd.xlane.f32.xlu0 %v1347_v21  ;;  %v3133_v53 = vld [vmem:[%s3233_s26 + $0x18] sm:$0xff] }
 0x699   : > { %v3082_v54 = vpop.eup %3081  ;;  %2869 = vmatpush3.bf16.msra.mxu1 %v2866_v45  ;;  %v3132_v45 = vld [vmem:[%s3233_s26] sm:$0xff] }
 0x69a   : > { %v1353_v55 = vsel %vm867_vm3, %v3082_v54, 0.0 }
 0x69b   : > { %1354 = vadd.xlane.f32.xlu1 %v1353_v55  ;;  %v3134_v55 = vld [vmem:[%s3233_s26 + $0x10] sm:$0xff] }
 0x6ac   : > { %3015 = vrot.lane.b32.xlu1 %v3368_v22, %s3151_s15 }
 0x6ad   : > { %3010 = vrot.lane.b32.xlu0 %v3359_v15, %s3151_s15 }
 0x717   : > { %v1340_v56 = vpop.xlane.xlu1 %1339 }
 0x718   : > { %v1337_v57 = vpop.xlane.xlu0 %1336 }
 0x719   : > { %3083 = vrcp.f32 %v1337_v57 }
 0x71a   : > { %3085 = vrcp.f32 %v1340_v56 }
 0x71c   : > { %v1346_v29 = vpop.xlane.xlu1 %1345 }
 0x720   : > { %v1352_v58 = vpop.xlane.xlu1 %1351  ;;  %v1343_v28 = vpop.xlane.xlu0 %1342 }
 0x721   : > { %3087 = vrcp.f32 %v1343_v28  ;;  %v3135_v28 = vld [vmem:[%s3233_s26 + $0x28] sm:$0xff] }
 0x722   : > { %3089 = vrcp.f32 %v1346_v29 }
 0x723   : > { %v3084_v38 = vpop.eup %3083 }
 0x724   : > { %v1358_v59 = vpop.xlane.xlu1 %1357  ;;  %v1349_v60 = vpop.xlane.xlu0 %1348  ;;  %v1367_v62 = vmul.f32 %v3084_v38, %v3070_v36 }
 0x725   : > { %3091 = vrcp.f32 %v1349_v60  ;;  %v3086_v3 = vpop.eup %3085 }
 0x726   : > { %2698 = vmatprep.mubr.msk.f32.mxu1 %vm867_vm3, %v1367_v62  ;;  %3093 = vrcp.f32 %v1352_v58  ;;  %v1368_v23 = vmul.f32 %v3086_v3, %v3591_v35 }
 0x728   : > { %v1355_v61 = vpop.xlane.xlu1 %1354  ;;  %v3011_v39 = vpop.permute.xlu0 %3010 }
 0x729   : > { %v3013_v22 = vunpack.i.h.bf16 %v3011_v39  ;;  %v3012_v48 = vunpack.i.l.bf16 %v3011_v39  ;;  %3095 = vrcp.f32 %v1355_v61  ;;  %v3136_v61 = vld [vmem:[%s3233_s26 + $0x20] sm:$0xff] }
 0x72a   : > { %3097 = vrcp.f32 %v1358_v59 }
 0x72b   : > { %v2870_v15 = vpack.c.bf16 %v3013_v22, %v3012_v48  ;;  %v3088_v17 = vpop.eup %3087 }
 0x72c   : > { %v3016_v63 = vpop.permute.xlu1 %3015  ;;  %v3090_v0 = vpop.eup %3089  ;;  %v1369_v36 = vmul.f32 %v3088_v17, %v3076_v44 }
 0x72d   : > { %v3018_v26 = vunpack.i.h.bf16 %v3016_v63  ;;  %v3017_v9 = vunpack.i.l.bf16 %v3016_v63  ;;  %2871 = vmatprep.subr.bf16.mxu1 %v2870_v15  ;;  %v1370_v2 = vmul.f32 %v3090_v0, %v3596_v11  ;;  %v693_v11 = vld [vmem:[%s3855_s4] sm:$0xff] }
 0x72e   : > { %2873 = vmatpush3.bf16.msra.mxu1 %v2870_v15  ;;  %v2882_v43 = vpack.c.bf16 %v694_v42, %v693_v11  ;;  %v3137_v15 = vld [vmem:[%s3233_s26 + $0x38] sm:$0xff] }
 0x72f   : > { %v2874_v8 = vpack.c.bf16 %v3018_v26, %v3017_v9  ;;  %v3092_v1 = vpop.eup %3091  ;;  %v3138_v9 = vld [vmem:[%s3233_s26 + $0x30] sm:$0xff] }
 0x730   : > { %v3094_v7 = vpop.eup %3093  ;;  %v1371_v12 = vmul.f32 %v3092_v1, %v3080_v52 }
 0x731   : > { %2875 = vmatprep.subr.bf16.mxu1 %v2874_v8  ;;  %v1372_v35 = vmul.f32 %v3094_v7, %v3600_v4 }
 0x732   : > { %2877 = vmatpush3.bf16.msra.mxu1 %v2874_v8 }
 0x733   : > { %2879 = vmatprep.subr.bf16.mxu1 %v2878_v14  ;;  %v3096_v18 = vpop.eup %3095 }
 0x734   : > { %v3098_v37 = vpop.eup %3097  ;;  %v1373_v40 = vmul.f32 %v3096_v18, %v3082_v54 }
 0x735   : > { %2699 = vmatmul.mubr.msk.f32.vlgmr.msra.gmra.mrb[8].mxu1 %vm867_vm3, %v1368_v23  ;;  %v1374_v41 = vmul.f32 %v3098_v37, %v3605_v46 }
 0x736   : > { %2701 = vmatprep.mubr.msk.f32.mxu1 %vm867_vm3, %v1369_v36  ;;  %2881 = vmatpush3.bf16.msra.mxu1 %v2878_v14 }
 0x737   : > { %2883 = vmatprep.subr.bf16.mxu1 %v2882_v43 }
 0x739   : > { %2702 = vmatmul.mubr.msk.f32.gmra.mrb[10].mxu1 %vm867_vm3, %v1370_v2 }
 0x73a   : > { %2704 = vmatprep.mubr.msk.f32.mxu1 %vm867_vm3, %v1371_v12 }
 0x73d   : > { %2705 = vmatmul.mubr.msk.f32.gmra.mrb[12].mxu1 %vm867_vm3, %v1372_v35 }
 0x73e   : > { %2707 = vmatprep.mubr.msk.f32.mxu1 %vm867_vm3, %v1373_v40 }
 0x741   : > { %2708 = vmatmul.mubr.msk.f32.gmra.mrb[14].mxu1 %vm867_vm3, %v1374_v41 }
 0x808   : > { %v2700_v20 = vpop.f32.mrb[8].mxu1 }
 0x809   : > { %v1489_v4 = vpop.f32.mrb[9].mxu1 }
 0x80a   : > { %2714 = vmatprep.mubr.msk.f32.mxu1 %vm729_vm1, %v1489_v4 }
 0x80b   : > { %2715 = vmatmul.mubr.msk.f32.vlgmr.msra.gmra.mrb[16].mxu1 %vm729_vm1, %v2700_v20 }
 0x80c   : > { %v2703_v10 = vpop.f32.mrb[10].mxu1  ;;  %2885 = vmatpush3.bf16.msra.mxu1 %v2882_v43 }
 0x80d   : > { %v1499_v16 = vpop.f32.mrb[11].mxu1 }
 0x80e   : > { %2717 = vmatprep.mubr.msk.f32.mxu1 %vm729_vm1, %v1499_v16 }
 0x80f   : > { %2718 = vmatmul.mubr.msk.f32.gmra.mrb[18].mxu1 %vm729_vm1, %v2703_v10 }
 0x810   : > { %v2706_v44 = vpop.f32.mrb[12].mxu1 }
 0x811   : > { %v1509_v47 = vpop.f32.mrb[13].mxu1 }
 0x812   : > { %2720 = vmatprep.mubr.msk.f32.mxu1 %vm729_vm1, %v1509_v47 }
 0x813   : > { %2721 = vmatmul.mubr.msk.f32.gmra.mrb[20].mxu1 %vm729_vm1, %v2706_v44 }
 0x814   : > { %v2709_v50 = vpop.f32.mrb[14].mxu1 }
 0x815   : > { %v1519_v51 = vpop.f32.mrb[15].mxu1 }
 0x816   : > { %2723 = vmatprep.mubr.msk.f32.mxu1 %vm729_vm1, %v1519_v51 }
 0x817   : > { %2724 = vmatmul.mubr.msk.f32.gmra.mrb[22].mxu1 %vm729_vm1, %v2709_v50 }
 0x818   : > { %2730 = vmatprep.mubr.msk.f32.mxu1 %vm729_vm1, %v3541_v25  ;;  %v2431_v25 = vld [vmem:[%s3856_s5] ss:$0 sm:$0xff] }
 0x81b   : > { %2731 = vmatmul.mubr.msk.f32.vlgmr.msra.gmra.mrb[16].mxu1 %vm729_vm1, %v3539_v24 }
 0x81c   : > { %2733 = vmatprep.mubr.msk.f32.mxu1 %vm729_vm1, %v3545_v30  ;;  %v3131_v30 = vld [vmem:[%s3233_s26 + $0x8] sm:$0xff] }
 0x81f   : > { %2734 = vmatmul.mubr.msk.f32.gmra.mrb[18].mxu1 %vm729_vm1, %v3543_v27 }
 0x820   : > { %2736 = vmatprep.mubr.msk.f32.mxu1 %vm729_vm1, %v3549_v32 }
 0x823   : > { %2737 = vmatmul.mubr.msk.f32.gmra.mrb[20].mxu1 %vm729_vm1, %v3547_v31 }
 0x824   : > { %2739 = vmatprep.mubr.msk.f32.mxu1 %vm729_vm1, %v3553_v34 }
 0x827   : > { %2740 = vmatmul.mubr.msk.f32.gmra.mrb[22].mxu1 %vm729_vm1, %v3551_v33 }
 0x8ee   : > { %v2732_v24 = vpop.f32.mrb[16].mxu1 }
 0x8ef   : > { %v1787_v27 = vadd.f32 %v3131_v30, %v2732_v24  ;;  %v1747_v46 = vpop.f32.mrb[17].mxu1 }
 0x8f0   : > { %v1786_v32 = vadd.f32 %v3132_v45, %v1747_v46 }
 0x8f1   : > { %v3668_v52 = vadd.f32 %v2431_v25, %v1787_v27 }
 0x8f2   : > { %v3670_v31 = vadd.f32 %v2431_v25, %v1786_v32  ;;  %v2735_v34 = vpop.f32.mrb[18].mxu1 }
 0x8f3   : > { %v1789_v21 = vadd.f32 %v3133_v53, %v2735_v34  ;;  %v1757_v33 = vpop.f32.mrb[19].mxu1  ;;  %v1813_v54 = vsel %vm423_vm0, %v3668_v52, 0.0 }
 0x8f4   : > { %v1788_v56 = vadd.f32 %v3134_v55, %v1757_v33  ;;  %1814 = vadd.xlane.f32.xlu1 %v1813_v54  ;;  %v1810_v57 = vsel %vm423_vm0, %v3670_v31, 0.0 }
 0x8f5   : > { %v3678_v29 = vadd.f32 %v2431_v25, %v1789_v21  ;;  %1811 = vadd.xlane.f32.xlu0 %v1810_v57 }
 0x8f6   : > { %v2738_v58 = vpop.f32.mrb[20].mxu1  ;;  %v3683_v62 = vadd.f32 %v2431_v25, %v1788_v56 }
 0x8f7   : > { %v1791_v38 = vadd.f32 %v3135_v28, %v2738_v58  ;;  %v1767_v59 = vpop.f32.mrb[21].mxu1  ;;  %v1819_v60 = vsel %vm423_vm0, %v3678_v29, 0.0 }
 0x8f8   : > { %v1790_v39 = vadd.f32 %v3136_v61, %v1767_v59  ;;  %v1816_v14 = vsel %vm423_vm0, %v3683_v62, 0.0  ;;  %v1938_v61 = vld [vmem:[%s3859_s8] sm:$0xff] }
 0x8f9   : > { %v3686_v22 = vadd.f32 %v2431_v25, %v1791_v38  ;;  %1820 = vadd.xlane.f32.xlu0 %v1819_v60 }
 0x8fa   : > { %v2741_v48 = vpop.f32.mrb[22].mxu1  ;;  %v3691_v26 = vadd.f32 %v2431_v25, %v1790_v39  ;;  %v1939_v39 = vld [vmem:[%s3859_s8 + $0x8] sm:$0xff] }
 0x8fb   : > { %v1793_v63 = vadd.f32 %v3137_v15, %v2741_v48  ;;  %v1777_v49 = vpop.f32.mrb[23].mxu1  ;;  %v1825_v5 = vsel %vm423_vm0, %v3686_v22, 0.0  ;;  %v2886_v48 = vpack.c.bf16 %v1939_v39, %v1938_v61  ;;  %v1940_v15 = vld [vmem:[%s3859_s8 + $0x10] sm:$0xff] }
 0x8fc   : > { %v1792_v8 = vadd.f32 %v3138_v9, %v1777_v49  ;;  %1826 = vadd.xlane.f32.xlu1 %v1825_v5  ;;  %v1822_v0 = vsel %vm423_vm0, %v3691_v26, 0.0 }
 0x8fd   : > { %v3696_v3 = vadd.f32 %v2431_v25, %v1793_v63  ;;  %1817 = vadd.xlane.f32.xlu0 %v1816_v14  ;;  %2887 = vmatprep.subr.bf16.mxu0 %v2886_v48  ;;  %v1941_v63 = vld [vmem:[%s3859_s8 + $0x18] sm:$0xff] }
 0x8fe   : > { %v3700_v23 = vadd.f32 %v2431_v25, %v1792_v8  ;;  %2889 = vmatpush3.bf16.msra.mxu0 %v2886_v48  ;;  %v2890_v49 = vpack.c.bf16 %v1941_v63, %v1940_v15 }
 0x8ff   : > { %v1831_v17 = vsel %vm423_vm0, %v3696_v3, 0.0 }
 0x900   : > { %1832 = vadd.xlane.f32.xlu1 %v1831_v17  ;;  %v1828_v36 = vsel %vm423_vm0, %v3700_v23, 0.0  ;;  %2891 = vmatprep.subr.bf16.mxu0 %v2890_v49 }
 0x901   : > { %1823 = vadd.xlane.f32.xlu0 %v1822_v0 }
 0x902   : > { %2893 = vmatpush3.bf16.msra.mxu0 %v2890_v49 }
 0x905   : > { %1829 = vadd.xlane.f32.xlu0 %v1828_v36 }
 0x981   : > { %v1815_v1 = vpop.xlane.xlu1 %1814 }
 0x982   : > { %v1835_v2 = vmul.f32 0.03125, %v1815_v1  ;;  %v1812_v7 = vpop.xlane.xlu0 %1811 }
 0x983   : > { %v1834_v12 = vmul.f32 0.03125, %v1812_v7 }
 0x984   : > { %v3707_v18 = vsub.f32 %v3668_v52, %v1835_v2 }
 0x985   : > { %v3710_v35 = vsub.f32 %v3670_v31, %v1834_v12 }
 0x986   : > { %v1821_v37 = vpop.xlane.xlu0 %1820  ;;  %v1851_v40 = vmul.f32 %v3707_v18, %v3707_v18 }
 0x987   : > { %v1837_v41 = vmul.f32 0.03125, %v1821_v37  ;;  %v1850_v11 = vmul.f32 %v3710_v35, %v3710_v35 }
 0x988   : > { %v1861_v42 = vsel %vm423_vm0, %v1851_v40, 0.0 }
 0x989   : > { %v3718_v43 = vsub.f32 %v3678_v29, %v1837_v41  ;;  %v1827_v20 = vpop.xlane.xlu1 %1826  ;;  %1862 = vadd.xlane.f32.xlu1 %v1861_v42  ;;  %v1858_v4 = vsel %vm423_vm0, %v1850_v11, 0.0  ;;  %v1809_v41 = vld [vmem:[%s3858_s7] sm:$0x3] }
 0x98a   : > { %v1839_v10 = vmul.f32 0.03125, %v1827_v20  ;;  %v1818_v16 = vpop.xlane.xlu0 %1817  ;;  %1859 = vadd.xlane.f32.xlu0 %v1858_v4 }
 0x98b   : > { %v1836_v44 = vmul.f32 0.03125, %v1818_v16  ;;  %v1853_v47 = vmul.f32 %v3718_v43, %v3718_v43 }
 0x98c   : > { %v3724_v50 = vsub.f32 %v3686_v22, %v1839_v10  ;;  %v1917_v10 = vrot.slane %v1809_v41, %v531_v13 }
 0x98d   : > { %v3727_v51 = vsub.f32 %v3683_v62, %v1836_v44  ;;  %v1833_v24 = vpop.xlane.xlu1 %1832  ;;  %v1867_v25 = vsel %vm423_vm0, %v1853_v47, 0.0 }
 0x98e   : > { %v1841_v30 = vmul.f32 0.03125, %v1833_v24  ;;  %v1824_v27 = vpop.xlane.xlu0 %1823  ;;  %1868 = vadd.xlane.f32.xlu1 %v1867_v25  ;;  %v1855_v46 = vmul.f32 %v3724_v50, %v3724_v50  ;;  %v1929_v25 = vrot.slane %v1809_v41, %v543_v19  ;;  %v2125_v41 = vld [vmem:[%s3861_s10 + $0x38] sm:$0xff] }
 0x98f   : > { %v1838_v45 = vmul.f32 0.03125, %v1824_v27  ;;  %v1852_v32 = vmul.f32 %v3727_v51, %v3727_v51 }
 0x990   : > { %v3735_v34 = vsub.f32 %v3696_v3, %v1841_v30  ;;  %v1873_v53 = vsel %vm423_vm0, %v1855_v46, 0.0 }
 0x991   : > { %v3739_v21 = vsub.f32 %v3691_v26, %v1838_v45  ;;  %v1864_v33 = vsel %vm423_vm0, %v1852_v32, 0.0 }
 0x992   : > { %1874 = vadd.xlane.f32.xlu1 %v1873_v53  ;;  %1865 = vadd.xlane.f32.xlu0 %v1864_v33  ;;  %v1830_v54 = vpop.xlane.xlu0 %1829  ;;  %v1857_v55 = vmul.f32 %v3735_v34, %v3735_v34 }
 0x993   : > { %v1840_v56 = vmul.f32 0.03125, %v1830_v54  ;;  %v1854_v57 = vmul.f32 %v3739_v21, %v3739_v21 }
 0x994   : > { %v1879_v58 = vsel %vm423_vm0, %v1857_v55, 0.0 }
 0x995   : > { %v3748_v28 = vsub.f32 %v3700_v23, %v1840_v56  ;;  %v1870_v38 = vsel %vm423_vm0, %v1854_v57, 0.0 }
 0x996   : > { %1880 = vadd.xlane.f32.xlu1 %v1879_v58  ;;  %1871 = vadd.xlane.f32.xlu0 %v1870_v38 }
 0x997   : > { %v1856_v59 = vmul.f32 %v3748_v28, %v3748_v28 }
 0x999   : > { %v1876_v60 = vsel %vm423_vm0, %v1856_v59, 0.0 }
 0x99a   : > { %1877 = vadd.xlane.f32.xlu0 %v1876_v60 }
 0xa16   : > { %v1863_v5 = vpop.xlane.xlu1 %1862 }
 0xa17   : > { %v1883_v9 = vmul.f32 0.03125, %v1863_v5  ;;  %v1860_v8 = vpop.xlane.xlu0 %1859 }
 0xa18   : > { %v1882_v14 = vmul.f32 0.03125, %v1860_v8 }
 0xa19   : > { %v1891_v17 = vadd.f32 1e-05, %v1883_v9 }
 0xa1a   : > { %v1890_v0 = vadd.f32 1e-05, %v1882_v14 }
 0xa1b   : > { %3099 = vrsqrt.f32 %v1891_v17  ;;  %v1869_v36 = vpop.xlane.xlu1 %1868 }
 0xa1c   : > { %3101 = vrsqrt.f32 %v1890_v0  ;;  %v1885_v1 = vmul.f32 0.03125, %v1869_v36  ;;  %v2120_v36 = vld [vmem:[%s3861_s10 + $0x10] sm:$0xff] }
 0xa1e   : > { %v1893_v2 = vadd.f32 1e-05, %v1885_v1  ;;  %v2121_v1 = vld [vmem:[%s3861_s10 + $0x18] sm:$0xff] }
 0xa1f   : > { %v1875_v7 = vpop.xlane.xlu1 %1874  ;;  %v1866_v12 = vpop.xlane.xlu0 %1865 }
 0xa20   : > { %3103 = vrsqrt.f32 %v1893_v2  ;;  %v1887_v37 = vmul.f32 0.03125, %v1875_v7  ;;  %v1884_v40 = vmul.f32 0.03125, %v1866_v12  ;;  %v2898_v2 = vpack.c.bf16 %v2121_v1, %v2120_v36  ;;  %v2122_v7 = vld [vmem:[%s3861_s10 + $0x20] sm:$0xff]  ;;  %v2123_v12 = vld [vmem:[%s3861_s10 + $0x28] sm:$0xff] }
 0xa22   : > { %v1895_v11 = vadd.f32 1e-05, %v1887_v37  ;;  %v1892_v42 = vadd.f32 1e-05, %v1884_v40  ;;  %v2902_v37 = vpack.c.bf16 %v2123_v12, %v2122_v7  ;;  %v2124_v40 = vld [vmem:[%s3861_s10 + $0x30] sm:$0xff] }
 0xa23   : > { %v1881_v20 = vpop.xlane.xlu1 %1880  ;;  %v1872_v4 = vpop.xlane.xlu0 %1871 }
 0xa24   : > { %3105 = vrsqrt.f32 %v1895_v11  ;;  %v1889_v16 = vmul.f32 0.03125, %v1881_v20  ;;  %v1886_v44 = vmul.f32 0.03125, %v1872_v4  ;;  %v2906_v11 = vpack.c.bf16 %v2125_v41, %v2124_v40 }
 0xa25   : > { %v3100_v47 = vpop.eup %3099  ;;  %3107 = vrsqrt.f32 %v1892_v42  ;;  %v2432_v42 = vld [vmem:[%s3860_s9] ss:$0 sm:$0xff] }
 0xa26   : > { %v3102_v24 = vpop.eup %3101  ;;  %v1907_v30 = vmul.f32 %v3100_v47, %v3707_v18  ;;  %v1897_v27 = vadd.f32 1e-05, %v1889_v16  ;;  %v1894_v46 = vadd.f32 1e-05, %v1886_v44 }
 0xa27   : > { %v1878_v45 = vpop.xlane.xlu0 %1877  ;;  %v1906_v32 = vmul.f32 %v3102_v24, %v3710_v35 }
 0xa28   : > { %v1919_v53 = vmul.f32 %v1917_v10, %v1907_v30  ;;  %3109 = vrsqrt.f32 %v1897_v27  ;;  %v1888_v33 = vmul.f32 0.03125, %v1878_v45 }
 0xa29   : > { %3111 = vrsqrt.f32 %v1894_v46  ;;  %v1918_v13 = vmul.f32 %v1917_v10, %v1906_v32 }
 0xa2a   : > { %v3104_v54 = vpop.eup %3103  ;;  %v1931_v55 = vadd.f32 %v1929_v25, %v1919_v53  ;;  %v1896_v56 = vadd.f32 1e-05, %v1888_v33 }
 0xa2b   : > { %v1930_v57 = vadd.f32 %v1929_v25, %v1918_v13  ;;  %v1909_v58 = vmul.f32 %v3104_v54, %v3718_v43 }
 0xa2c   : > { %3113 = vrsqrt.f32 %v1896_v56 }
 0xa2d   : > { %2750 = vmatprep.mubr.msk.f32.mxu0 %vm423_vm0, %v1930_v57  ;;  %v1921_v6 = vmul.f32 %v1917_v10, %v1909_v58 }
 0xa2e   : > { %v3106_v19 = vpop.eup %3105  ;;  %2751 = vmatmul.mubr.msk.f32.vlgmr.msra.gmra.mrb[24].mxu0 %vm423_vm0, %v1931_v55 }
 0xa2f   : > { %v3108_v18 = vpop.eup %3107  ;;  %v1933_v35 = vadd.f32 %v1929_v25, %v1921_v6  ;;  %v1911_v38 = vmul.f32 %v3106_v19, %v3724_v50 }
 0xa30   : > { %v1908_v59 = vmul.f32 %v3108_v18, %v3727_v51 }
 0xa31   : > { %v1923_v60 = vmul.f32 %v1917_v10, %v1911_v38 }
 0xa32   : > { %v3110_v61 = vpop.eup %3109  ;;  %v1920_v39 = vmul.f32 %v1917_v10, %v1908_v59 }
 0xa33   : > { %v3112_v48 = vpop.eup %3111  ;;  %v1935_v15 = vadd.f32 %v1929_v25, %v1923_v60  ;;  %v1913_v43 = vmul.f32 %v3110_v61, %v3735_v34 }
 0xa34   : > { %v1932_v63 = vadd.f32 %v1929_v25, %v1920_v39  ;;  %v1910_v49 = vmul.f32 %v3112_v48, %v3739_v21  ;;  %v2118_v21 = vld [vmem:[%s3861_s10] sm:$0xff] }
 0xa35   : > { %v1925_v5 = vmul.f32 %v1917_v10, %v1913_v43 }
 0xa36   : > { %v3114_v9 = vpop.eup %3113  ;;  %2753 = vmatprep.mubr.msk.f32.mxu0 %vm423_vm0, %v1932_v63  ;;  %v1922_v8 = vmul.f32 %v1917_v10, %v1910_v49 }
 0xa37   : > { %2754 = vmatmul.mubr.msk.f32.gmra.mrb[26].mxu0 %vm423_vm0, %v1933_v35  ;;  %v1912_v50 = vmul.f32 %v3114_v9, %v3748_v28  ;;  %v1937_v51 = vadd.f32 %v1929_v25, %v1925_v5  ;;  %v2119_v28 = vld [vmem:[%s3861_s10 + $0x8] sm:$0xff] }
 0xa38   : > { %v1934_v14 = vadd.f32 %v1929_v25, %v1922_v8  ;;  %v2894_v0 = vpack.c.bf16 %v2119_v28, %v2118_v21 }
 0xa39   : > { %v1924_v17 = vmul.f32 %v1917_v10, %v1912_v50 }
 0xa3a   : > { %2756 = vmatprep.mubr.msk.f32.mxu0 %vm423_vm0, %v1934_v14  ;;  %2895 = vmatprep.subr.bf16.mxu0 %v2894_v0 }
 0xa3b   : > { %2757 = vmatmul.mubr.msk.f32.gmra.mrb[28].mxu0 %vm423_vm0, %v1935_v15  ;;  %v1936_v34 = vadd.f32 %v1929_v25, %v1924_v17  ;;  %2910 = vmatprep.subr.bf16.mxu1 %v2894_v0 }
 0xa3c   : > { %2897 = vmatpush3.bf16.msra.mxu0 %v2894_v0  ;;  %2914 = vmatpush3.bf16.msra.mxu1 %v2894_v0 }
 0xa3d   : > { %2759 = vmatprep.mubr.msk.f32.mxu0 %vm423_vm0, %v1936_v34  ;;  %2899 = vmatprep.subr.bf16.mxu0 %v2898_v2 }
 0xa3e   : > { %2911 = vmatprep.subr.bf16.mxu1 %v2898_v2 }
 0xa3f   : > { %2760 = vmatmul.mubr.msk.f32.gmra.mrb[30].mxu0 %vm423_vm0, %v1937_v51 }
 0xa40   : > { %2901 = vmatpush3.bf16.msra.mxu0 %v2898_v2  ;;  %2915 = vmatpush3.bf16.msra.mxu1 %v2898_v2 }
 0xa41   : > { %2903 = vmatprep.subr.bf16.mxu0 %v2902_v37  ;;  %2912 = vmatprep.subr.bf16.mxu1 %v2902_v37 }
 0xa44   : > { %2905 = vmatpush3.bf16.msra.mxu0 %v2902_v37  ;;  %2916 = vmatpush3.bf16.msra.mxu1 %v2902_v37 }
 0xa45   : > { %2907 = vmatprep.subr.bf16.mxu0 %v2906_v11  ;;  %2913 = vmatprep.subr.bf16.mxu1 %v2906_v11 }
 0xa48   : > { %2909 = vmatpush3.bf16.msra.mxu0 %v2906_v11  ;;  %2917 = vmatpush3.bf16.msra.mxu1 %v2906_v11 }
 0xb01   : > { %v2752_v20 = vpop.f32.mrb[24].mxu0 }
 0xb02   : > { %v2045_v4 = vadd.f32 %v2752_v20, %v2432_v42  ;;  %v2039_v10 = vpop.f32.mrb[25].mxu0 }
 0xb03   : > { %v2040_v16 = vadd.f32 %v2432_v42, %v2039_v10 }
 0xb04   : > { %v2087_v44 = vmul.f32 0.70710677, %v2045_v4  ;;  %v2079_v35 = vmul.f32 0.5, %v2045_v4  ;;  %v2449_v4 = vld [vmem:[%s3862_s11] ss:$0 sm:$0xff] }
 0xb05   : > { %v2086_v47 = vmul.f32 0.70710677, %v2040_v16  ;;  %v2078_v58 = vmul.f32 0.5, %v2040_v16 }
 0xb06   : > { %3115 = verf.f32 %v2087_v44 }
 0xb07   : > { %3117 = verf.f32 %v2086_v47 }
 0xb0a   : > { %v2755_v24 = vpop.f32.mrb[26].mxu0 }
 0xb0b   : > { %v2055_v25 = vadd.f32 %v2755_v24, %v2432_v42  ;;  %v2049_v30 = vpop.f32.mrb[27].mxu0 }
 0xb0c   : > { %v2050_v27 = vadd.f32 %v2432_v42, %v2049_v30 }
 0xb0d   : > { %v2089_v46 = vmul.f32 0.70710677, %v2055_v25  ;;  %v2081_v8 = vmul.f32 0.5, %v2055_v25 }
 0xb0e   : > { %v2088_v45 = vmul.f32 0.70710677, %v2050_v27  ;;  %v2758_v32 = vpop.f32.mrb[28].mxu0  ;;  %v2080_v5 = vmul.f32 0.5, %v2050_v27 }
 0xb0f   : > { %3119 = verf.f32 %v2089_v46  ;;  %v2065_v53 = vadd.f32 %v2758_v32, %v2432_v42  ;;  %v2059_v33 = vpop.f32.mrb[29].mxu0 }
 0xb10   : > { %v3116_v13 = vpop.eup %3115  ;;  %3121 = verf.f32 %v2088_v45  ;;  %v2060_v54 = vadd.f32 %v2432_v42, %v2059_v33 }
 0xb11   : > { %v3118_v55 = vpop.eup %3117  ;;  %v2103_v56 = vadd.f32 1.0, %v3116_v13  ;;  %v2091_v57 = vmul.f32 0.70710677, %v2065_v53  ;;  %v2083_v0 = vmul.f32 0.5, %v2065_v53 }
 0xb12   : > { %v2102_v6 = vadd.f32 1.0, %v3118_v55  ;;  %v2090_v19 = vmul.f32 0.70710677, %v2060_v54  ;;  %v2761_v18 = vpop.f32.mrb[30].mxu0  ;;  %v2082_v21 = vmul.f32 0.5, %v2060_v54 }
 0xb13   : > { %3123 = verf.f32 %v2091_v57  ;;  %v2075_v38 = vadd.f32 %v2761_v18, %v2432_v42  ;;  %v2069_v59 = vpop.f32.mrb[31].mxu0  ;;  %v2111_v39 = vmul.f32 %v2103_v56, %v2079_v35 }
 0xb14   : > { %v2110_v60 = vmul.f32 %v2102_v6, %v2078_v58  ;;  %3125 = verf.f32 %v2090_v19  ;;  %v2070_v61 = vadd.f32 %v2432_v42, %v2069_v59 }
 0xb15   : > { %v2093_v48 = vmul.f32 0.70710677, %v2075_v38  ;;  %v2085_v41 = vmul.f32 0.5, %v2075_v38 }
 0xb16   : > { %v2092_v15 = vmul.f32 0.70710677, %v2070_v61  ;;  %2778 = vmatprep.mubr.msk.f32.mxu0 %vm867_vm3, %v2110_v60  ;;  %v2084_v37 = vmul.f32 0.5, %v2070_v61 }
 0xb17   : > { %3127 = verf.f32 %v2093_v48  ;;  %2779 = vmatmul.mubr.msk.f32.vlgmr.msra.gmra.mrb[32].mxu0 %vm867_vm3, %v2111_v39 }
 0xb18   : > { %3129 = verf.f32 %v2092_v15 }
 0xb19   : > { %v3120_v43 = vpop.eup %3119 }
 0xb1a   : > { %v3122_v63 = vpop.eup %3121  ;;  %v2105_v49 = vadd.f32 1.0, %v3120_v43 }
 0xb1b   : > { %v2104_v9 = vadd.f32 1.0, %v3122_v63 }
 0xb1c   : > { %v2113_v17 = vmul.f32 %v2105_v49, %v2081_v8 }
 0xb1d   : > { %v3124_v50 = vpop.eup %3123  ;;  %v2112_v51 = vmul.f32 %v2104_v9, %v2080_v5 }
 0xb1e   : > { %v3126_v14 = vpop.eup %3125  ;;  %v2107_v34 = vadd.f32 1.0, %v3124_v50 }
 0xb1f   : > { %v2106_v28 = vadd.f32 1.0, %v3126_v14  ;;  %2781 = vmatprep.mubr.msk.f32.mxu0 %vm867_vm3, %v2112_v51 }
 0xb20   : > { %2782 = vmatmul.mubr.msk.f32.gmra.mrb[34].mxu0 %vm867_vm3, %v2113_v17  ;;  %v2115_v7 = vmul.f32 %v2107_v34, %v2083_v0 }
 0xb21   : > { %v3128_v36 = vpop.eup %3127  ;;  %v2114_v1 = vmul.f32 %v2106_v28, %v2082_v21 }
 0xb22   : > { %v3130_v2 = vpop.eup %3129  ;;  %v2109_v12 = vadd.f32 1.0, %v3128_v36 }
 0xb23   : > { %v2108_v40 = vadd.f32 1.0, %v3130_v2  ;;  %2784 = vmatprep.mubr.msk.f32.mxu0 %vm867_vm3, %v2114_v1 }
 0xb24   : > { %2785 = vmatmul.mubr.msk.f32.gmra.mrb[36].mxu0 %vm867_vm3, %v2115_v7  ;;  %v2117_v42 = vmul.f32 %v2109_v12, %v2085_v41 }
 0xb25   : > { %v2116_v11 = vmul.f32 %v2108_v40, %v2084_v37 }
 0xb27   : > { %2787 = vmatprep.mubr.msk.f32.mxu1 %vm867_vm3, %v2116_v11 }
 0xb28   : > { %2788 = vmatmul.mubr.msk.f32.vlgmr.msra.gmra.mrb[24].mxu1 %vm867_vm3, %v2117_v42 }
 0xbea   : > { %v2780_v20 = vpop.f32.mrb[32].mxu0 }
 0xbeb   : > { %v2256_v10 = vadd.f32 %v2780_v20, %v3668_v52  ;;  %v2216_v16 = vpop.f32.mrb[33].mxu0 }
 0xbec   : > { %v2255_v44 = vadd.f32 %v2216_v16, %v3670_v31 }
 0xbed   : > { %v2271_v47 = vadd.f32 %v2449_v4, %v2256_v10 }
 0xbee   : > { %v2270_v24 = vadd.f32 %v2449_v4, %v2255_v44 }
 0xbef   : > { %2279 = vst.msk [vmem:[%s413_s13 + $0x8] sm:$0xff] %vm423_vm0, %v2271_v47 }
 0xbf0   : > { %2278 = vst.msk [vmem:[%s413_s13] sm:$0xff] %vm423_vm0, %v2270_v24 }
 0xbf3   : > { %v2783_v25 = vpop.f32.mrb[34].mxu0 }
 0xbf4   : > { %v2258_v30 = vadd.f32 %v2783_v25, %v3678_v29  ;;  %v2226_v27 = vpop.f32.mrb[35].mxu0 }
 0xbf5   : > { %v2257_v52 = vadd.f32 %v2226_v27, %v3683_v62 }
 0xbf6   : > { %v2273_v46 = vadd.f32 %v2449_v4, %v2258_v30 }
 0xbf7   : > { %v2272_v45 = vadd.f32 %v2449_v4, %v2257_v52  ;;  %v2786_v32 = vpop.f32.mrb[36].mxu0 }
 0xbf8   : > { %2281 = vst.msk [vmem:[%s413_s13 + $0x18] sm:$0xff] %vm423_vm0, %v2273_v46  ;;  %v2260_v53 = vadd.f32 %v2786_v32, %v3686_v22  ;;  %v2236_v31 = vpop.f32.mrb[37].mxu0 }
 0xbf9   : > { %2280 = vst.msk [vmem:[%s413_s13 + $0x10] sm:$0xff] %vm423_vm0, %v2272_v45  ;;  %v2259_v33 = vadd.f32 %v2236_v31, %v3691_v26 }
 0xbfa   : > { %v2275_v13 = vadd.f32 %v2449_v4, %v2260_v53 }
 0xbfb   : > { %v2274_v54 = vadd.f32 %v2449_v4, %v2259_v33  ;;  %v2789_v55 = vpop.f32.mrb[24].mxu1 }
 0xbfc   : > { %2283 = vst.msk [vmem:[%s413_s13 + $0x28] sm:$0xff] %vm423_vm0, %v2275_v13  ;;  %v2262_v29 = vadd.f32 %v2789_v55, %v3696_v3  ;;  %v2246_v62 = vpop.f32.mrb[25].mxu1 }
 0xbfd   : > { %2282 = vst.msk [vmem:[%s413_s13 + $0x20] sm:$0xff] %vm423_vm0, %v2274_v54  ;;  %v2261_v56 = vadd.f32 %v2246_v62, %v3700_v23 }
 0xbfe   : > { %v2277_v57 = vadd.f32 %v2449_v4, %v2262_v29 }
 0xbff   : > { %v2276_v58 = vadd.f32 %v2449_v4, %v2261_v56 }
 0xc00   : > { %2285 = vst.msk [vmem:[%s413_s13 + $0x38] sm:$0xff] %vm423_vm0, %v2277_v57 }
 0xc01   : > { %2284 = vst.msk [vmem:[%s413_s13 + $0x30] sm:$0xff] %vm423_vm0, %v2276_v58 }
 0xc02 PF: > { %s22_s21 = sadd.s32 1, %s3145_s21  }
 0xc03   : > { %p19_p4 = scmp.ge.s32.totalorder %s22_s21, 4  }
 0xc05   :  { %21 = sbr.rel (!%p19_p4) target bundleno = 1 (0x1), region = 99 }

</bundles_post_ra>
